<compile_context>
chip_gen: v5e
topology: v5e:2x2
jax: 0.10.0
libtpu: 0.0.40
codegen_flags: <defaults>
</compile_context>

<pallas_src>
import jax
import jax.numpy as jnp
from jax.experimental import pallas as pl
from jax.experimental.pallas import tpu as pltpu


def _round_up(n, m):
    return ((n + m - 1) // m) * m


_MAX_TILE_B = 512  # measured ~85% of HBM roofline at 512-row blocks


def _ae_mlp_kernel(x_ref,
                   w1_ref, b1_ref,
                   w2_ref, b2_ref,
                   w3_ref, b3_ref,
                   w4_ref, b4_ref,
                   o_ref):
    """Fused 4-layer MLP: (Linear+ReLU) x3, Linear.

    Activations are cast to bf16 only for the MXU dot inputs; accumulation,
    bias-add and ReLU are all f32 (v5e has no bf16 VPU path).
    """
    h = x_ref[...]
    # encoder layer 1: Linear(input_dim, 256) + ReLU
    h = jnp.dot(h.astype(jnp.bfloat16), w1_ref[...],
                preferred_element_type=jnp.float32) + b1_ref[...]
    h = jnp.maximum(h, 0.0)
    # encoder layer 2: Linear(256, 32 -> padded 128) + ReLU
    h = jnp.dot(h.astype(jnp.bfloat16), w2_ref[...],
                preferred_element_type=jnp.float32) + b2_ref[...]
    h = jnp.maximum(h, 0.0)
    # decoder layer 1: Linear(32 -> padded 128, 256) + ReLU
    h = jnp.dot(h.astype(jnp.bfloat16), w3_ref[...],
                preferred_element_type=jnp.float32) + b3_ref[...]
    h = jnp.maximum(h, 0.0)
    # decoder layer 2 (final): Linear(256, input_dim), no activation
    h = jnp.dot(h.astype(jnp.bfloat16), w4_ref[...],
                preferred_element_type=jnp.float32) + b4_ref[...]
    o_ref[...] = h.astype(o_ref.dtype)


def prepare_kernel_params(params):
    """Cast weights to bf16 and zero-pad the 32-wide latent to 128 lanes.

    Zero padding keeps the math identical: the padded pre-activations are 0,
    ReLU(0)=0, and the corresponding (zero) rows of w3 contribute nothing.
    """
    (w1, b1), (w2, b2), (w3, b3), (w4, b4) = params
    lat = w2.shape[1]
    lat_pad = max(128, _round_up(lat, 128))

    w2p = jnp.zeros((w2.shape[0], lat_pad), w2.dtype).at[:, :lat].set(w2)
    b2p = jnp.zeros((1, lat_pad), b2.dtype).at[:, :lat].set(b2)
    w3p = jnp.zeros((lat_pad, w3.shape[1]), w3.dtype).at[:lat, :].set(w3)

    bf = lambda w: w.astype(jnp.bfloat16)
    return ((bf(w1), b1), (bf(w2p), b2p), (bf(w3p), b3), (bf(w4), b4))


def _choose_tile_b(B):
    """Batch tile: as large as possible (<=512, multiple of 8), minimizing pad,
    and forcing >= 2 grid steps when B is big enough (v7x dual TensorCore)."""
    n_steps = pl.cdiv(B, _MAX_TILE_B)
    if n_steps < 2 and B > 128:
        n_steps = 2
    return _round_up(pl.cdiv(B, n_steps), 8)


def autoencoder_forward(x, kparams):
    """x: (B, C, H, W) float32. kparams from prepare_kernel_params().
    Returns (B, C, H, W) float32."""
    input_shape = x.shape
    B = x.shape[0]
    input_dim = x.shape[1] * x.shape[2] * x.shape[3]
    # torch.flatten(start_dim=1) equivalent (row-major, view only).
    x_in = x.reshape(B, input_dim)

    (w1, b1), (w2, b2), (w3, b3), (w4, b4) = kparams

    tile_b = _choose_tile_b(B)
    grid = (pl.cdiv(B, tile_b),)

    const_map = lambda i: (0, 0)          # weights/biases: resident across grid
    resident = lambda a: pl.BlockSpec(a.shape, const_map)
    x_spec = pl.BlockSpec((tile_b, input_dim), lambda i: (i, 0))
    o_spec = pl.BlockSpec((tile_b, input_dim), lambda i: (i, 0))

    n_rows = grid[0] * tile_b             # rows actually pushed through the MXU
    flops = 2 * n_rows * (w1.shape[0] * w1.shape[1]
                          + w2.shape[0] * w2.shape[1]
                          + w3.shape[0] * w3.shape[1]
                          + w4.shape[0] * w4.shape[1])
    param_bytes = sum(int(a.size) * a.dtype.itemsize
                      for pair in kparams for a in pair)
    bytes_accessed = param_bytes + 2 * B * input_dim * 4

    out = pl.pallas_call(
        _ae_mlp_kernel,
        out_shape=jax.ShapeDtypeStruct((B, input_dim), jnp.float32),
        grid=grid,
        in_specs=[
            x_spec,
            resident(w1), resident(b1),
            resident(w2), resident(b2),
            resident(w3), resident(b3),
            resident(w4), resident(b4),
        ],
        out_specs=o_spec,
        compiler_params=pltpu.CompilerParams(
            dimension_semantics=("parallel",)),
        cost_estimate=pl.CostEstimate(flops=flops, transcendentals=0,
                                      bytes_accessed=bytes_accessed),
    )(x_in, w1, b1, w2, b2, w3, b3, w4, b4)

    # out.view(input_shape)
    return out.reshape(input_shape)


def make_params(key, input_dim, encoder_hidden_dims):
    """Deterministic synthetic parameters. Weights stored (in, out); biases (1, out)."""
    enc_dims = [input_dim, *encoder_hidden_dims]                      # [1024, 256, 32]
    dec_hidden = encoder_hidden_dims[::-1][1:]                        # [256]
    dec_dims = [encoder_hidden_dims[-1], *dec_hidden, input_dim]      # [32, 256, 1024]
    layer_dims = list(zip(enc_dims[:-1], enc_dims[1:])) + \
                 list(zip(dec_dims[:-1], dec_dims[1:]))

    params = []
    for (fan_in, fan_out) in layer_dims:
        key, kw, kb = jax.random.split(key, 3)
        bound = 1.0 / jnp.sqrt(fan_in)
        w = jax.random.uniform(kw, (fan_in, fan_out), jnp.float32, -bound, bound)
        b = jax.random.uniform(kb, (1, fan_out), jnp.float32, -bound, bound)
        params.append((w, b))
    return params


def reference_forward(x, params):
    """Plain-JAX reference with matching bf16-inputs / f32-accumulate math."""
    B = x.shape[0]
    h = x.reshape(B, -1)

    def layer(h, w, b, relu):
        y = jnp.dot(h.astype(jnp.bfloat16), w.astype(jnp.bfloat16),
                    preferred_element_type=jnp.float32) + b
        return jnp.maximum(y, 0.0) if relu else y

    (w1, b1), (w2, b2), (w3, b3), (w4, b4) = params
    h = layer(h, w1, b1, True)
    h = layer(h, w2, b2, True)
    h = layer(h, w3, b3, True)
    h = layer(h, w4, b4, False)
    return h.reshape(x.shape)


if __name__ == "__main__":
    key = jax.random.PRNGKey(0)
    k_x, k_p = jax.random.split(key)

    # Small NCHW input: B=2, C=4, H=W=16  -> input_dim = 1024
    B, C, H, W = 2, 4, 16, 16
    input_dim = C * H * W
    encoder_hidden_dims = [256, 32]

    x = jax.random.normal(k_x, (B, C, H, W), jnp.float32)
    params = make_params(k_p, input_dim, encoder_hidden_dims)
    kparams = prepare_kernel_params(params)

    out = jax.jit(autoencoder_forward)(x, kparams)
    out = jax.block_until_ready(out)

    ref = reference_forward(x, params)
    assert out.shape == (B, C, H, W)
    assert jnp.allclose(out, ref, atol=1e-2, rtol=1e-2), \
        float(jnp.max(jnp.abs(out - ref)))

    print("KERNEL_OK")
</pallas_src>

<mosaic_0001>
module attributes {stable_mosaic.version = 11 : i64} {
  func.func @_ae_mlp_kernel(%arg0: i32, %arg1: memref<8x1024xf32, #tpu.memory_space<vmem>>, %arg2: memref<1024x256xbf16, #tpu.memory_space<vmem>>, %arg3: memref<1x256xf32, #tpu.memory_space<vmem>>, %arg4: memref<256x128xbf16, #tpu.memory_space<vmem>>, %arg5: memref<1x128xf32, #tpu.memory_space<vmem>>, %arg6: memref<128x256xbf16, #tpu.memory_space<vmem>>, %arg7: memref<1x256xf32, #tpu.memory_space<vmem>>, %arg8: memref<256x1024xbf16, #tpu.memory_space<vmem>>, %arg9: memref<1x1024xf32, #tpu.memory_space<vmem>>, %arg10: memref<8x1024xf32, #tpu.memory_space<vmem>>) attributes {dimension_semantics = [#tpu.dimension_semantics<parallel>], iteration_bounds = array<i64: 1>, scalar_prefetch = 0 : i64, scratch_operands = 0 : i64, tpu.core_type = #tpu.core_type<tc>, window_params = [{transform_indices = @transform_0, window_bounds = array<i64: 8, 1024>}, {pipeline_mode = #tpu.pipeline_mode<synchronous>, transform_indices = @transform_1, window_bounds = array<i64: 1024, 256>}, {pipeline_mode = #tpu.pipeline_mode<synchronous>, transform_indices = @transform_2, window_bounds = array<i64: 1, 256>}, {pipeline_mode = #tpu.pipeline_mode<synchronous>, transform_indices = @transform_3, window_bounds = array<i64: 256, 128>}, {pipeline_mode = #tpu.pipeline_mode<synchronous>, transform_indices = @transform_4, window_bounds = array<i64: 1, 128>}, {pipeline_mode = #tpu.pipeline_mode<synchronous>, transform_indices = @transform_5, window_bounds = array<i64: 128, 256>}, {pipeline_mode = #tpu.pipeline_mode<synchronous>, transform_indices = @transform_6, window_bounds = array<i64: 1, 256>}, {pipeline_mode = #tpu.pipeline_mode<synchronous>, transform_indices = @transform_7, window_bounds = array<i64: 256, 1024>}, {pipeline_mode = #tpu.pipeline_mode<synchronous>, transform_indices = @transform_8, window_bounds = array<i64: 1, 1024>}, {transform_indices = @transform_9, window_bounds = array<i64: 8, 1024>}]} {
    %c0 = arith.constant 0 : index
    %c0_0 = arith.constant 0 : index
    %0 = vector.load %arg1[%c0, %c0_0] : memref<8x1024xf32, #tpu.memory_space<vmem>>, vector<8x1024xf32>
    %1 = arith.truncf %0 : vector<8x1024xf32> to vector<8x1024xbf16>
    %c0_1 = arith.constant 0 : index
    %c0_2 = arith.constant 0 : index
    %2 = vector.load %arg2[%c0_1, %c0_2] : memref<1024x256xbf16, #tpu.memory_space<vmem>>, vector<1024x256xbf16>
    %cst = arith.constant dense<0.000000e+00> : vector<8x256xf32>
    %3 = tpu.matmul %1, %2, %cst {dimension_numbers = #tpu.dot_dimension_numbers<[1], [0], [0], [1], [0, 0, 1, 1], [], []>} : vector<8x1024xbf16>, vector<1024x256xbf16>, vector<8x256xf32> -> vector<8x256xf32>
    %c0_3 = arith.constant 0 : index
    %c0_4 = arith.constant 0 : index
    %4 = vector.load %arg3[%c0_3, %c0_4] : memref<1x256xf32, #tpu.memory_space<vmem>>, vector<1x256xf32>
    %5 = vector.broadcast %4 : vector<1x256xf32> to vector<8x256xf32>
    %6 = arith.addf %3, %5 : vector<8x256xf32>
    %cst_5 = arith.constant 0.000000e+00 : f32
    %7 = vector.broadcast %cst_5 : f32 to vector<8x256xf32>
    %8 = arith.maximumf %6, %7 : vector<8x256xf32>
    %9 = arith.truncf %8 : vector<8x256xf32> to vector<8x256xbf16>
    %c0_6 = arith.constant 0 : index
    %c0_7 = arith.constant 0 : index
    %10 = vector.load %arg4[%c0_6, %c0_7] : memref<256x128xbf16, #tpu.memory_space<vmem>>, vector<256x128xbf16>
    %cst_8 = arith.constant dense<0.000000e+00> : vector<8x128xf32>
    %11 = tpu.matmul %9, %10, %cst_8 {dimension_numbers = #tpu.dot_dimension_numbers<[1], [0], [0], [1], [0, 0, 1, 1], [], []>} : vector<8x256xbf16>, vector<256x128xbf16>, vector<8x128xf32> -> vector<8x128xf32>
    %c0_9 = arith.constant 0 : index
    %c0_10 = arith.constant 0 : index
    %12 = vector.load %arg5[%c0_9, %c0_10] : memref<1x128xf32, #tpu.memory_space<vmem>>, vector<1x128xf32>
    %13 = vector.broadcast %12 : vector<1x128xf32> to vector<8x128xf32>
    %14 = arith.addf %11, %13 : vector<8x128xf32>
    %cst_11 = arith.constant 0.000000e+00 : f32
    %15 = vector.broadcast %cst_11 : f32 to vector<8x128xf32>
    %16 = arith.maximumf %14, %15 : vector<8x128xf32>
    %17 = arith.truncf %16 : vector<8x128xf32> to vector<8x128xbf16>
    %c0_12 = arith.constant 0 : index
    %c0_13 = arith.constant 0 : index
    %18 = vector.load %arg6[%c0_12, %c0_13] : memref<128x256xbf16, #tpu.memory_space<vmem>>, vector<128x256xbf16>
    %cst_14 = arith.constant dense<0.000000e+00> : vector<8x256xf32>
    %19 = tpu.matmul %17, %18, %cst_14 {dimension_numbers = #tpu.dot_dimension_numbers<[1], [0], [0], [1], [0, 0, 1, 1], [], []>} : vector<8x128xbf16>, vector<128x256xbf16>, vector<8x256xf32> -> vector<8x256xf32>
    %c0_15 = arith.constant 0 : index
    %c0_16 = arith.constant 0 : index
    %20 = vector.load %arg7[%c0_15, %c0_16] : memref<1x256xf32, #tpu.memory_space<vmem>>, vector<1x256xf32>
    %21 = vector.broadcast %20 : vector<1x256xf32> to vector<8x256xf32>
    %22 = arith.addf %19, %21 : vector<8x256xf32>
    %cst_17 = arith.constant 0.000000e+00 : f32
    %23 = vector.broadcast %cst_17 : f32 to vector<8x256xf32>
    %24 = arith.maximumf %22, %23 : vector<8x256xf32>
    %25 = arith.truncf %24 : vector<8x256xf32> to vector<8x256xbf16>
    %c0_18 = arith.constant 0 : index
    %c0_19 = arith.constant 0 : index
    %26 = vector.load %arg8[%c0_18, %c0_19] : memref<256x1024xbf16, #tpu.memory_space<vmem>>, vector<256x1024xbf16>
    %cst_20 = arith.constant dense<0.000000e+00> : vector<8x1024xf32>
    %27 = tpu.matmul %25, %26, %cst_20 {dimension_numbers = #tpu.dot_dimension_numbers<[1], [0], [0], [1], [0, 0, 1, 1], [], []>} : vector<8x256xbf16>, vector<256x1024xbf16>, vector<8x1024xf32> -> vector<8x1024xf32>
    %c0_21 = arith.constant 0 : index
    %c0_22 = arith.constant 0 : index
    %28 = vector.load %arg9[%c0_21, %c0_22] : memref<1x1024xf32, #tpu.memory_space<vmem>>, vector<1x1024xf32>
    %29 = vector.broadcast %28 : vector<1x1024xf32> to vector<8x1024xf32>
    %30 = arith.addf %27, %29 : vector<8x1024xf32>
    %c0_23 = arith.constant 0 : index
    %c0_24 = arith.constant 0 : index
    %31 = vector.load %arg10[%c0_23, %c0_24] : memref<8x1024xf32, #tpu.memory_space<vmem>>, vector<8x1024xf32>
    tpu.vector_store %arg10[%c0_23, %c0_24], %30 {strides = array<i32>} : memref<8x1024xf32, #tpu.memory_space<vmem>>, vector<8x1024xf32>,
    return
  }
  func.func @transform_0(%arg0: i32) -> (i32, i32) {
    %c0_i32 = arith.constant 0 : i32
    %c0_i32_0 = arith.constant 0 : i32
    return %arg0, %c0_i32 : i32, i32
  }
  func.func @transform_1(%arg0: i32) -> (i32, i32) {
    %c0_i32 = arith.constant 0 : i32
    %c0_i32_0 = arith.constant 0 : i32
    %c0_i32_1 = arith.constant 0 : i32
    return %c0_i32, %c0_i32_0 : i32, i32
  }
  func.func @transform_2(%arg0: i32) -> (i32, i32) {
    %c0_i32 = arith.constant 0 : i32
    %c0_i32_0 = arith.constant 0 : i32
    %c0_i32_1 = arith.constant 0 : i32
    return %c0_i32, %c0_i32_0 : i32, i32
  }
  func.func @transform_3(%arg0: i32) -> (i32, i32) {
    %c0_i32 = arith.constant 0 : i32
    %c0_i32_0 = arith.constant 0 : i32
    %c0_i32_1 = arith.constant 0 : i32
    return %c0_i32, %c0_i32_0 : i32, i32
  }
  func.func @transform_4(%arg0: i32) -> (i32, i32) {
    %c0_i32 = arith.constant 0 : i32
    %c0_i32_0 = arith.constant 0 : i32
    %c0_i32_1 = arith.constant 0 : i32
    return %c0_i32, %c0_i32_0 : i32, i32
  }
  func.func @transform_5(%arg0: i32) -> (i32, i32) {
    %c0_i32 = arith.constant 0 : i32
    %c0_i32_0 = arith.constant 0 : i32
    %c0_i32_1 = arith.constant 0 : i32
    return %c0_i32, %c0_i32_0 : i32, i32
  }
  func.func @transform_6(%arg0: i32) -> (i32, i32) {
    %c0_i32 = arith.constant 0 : i32
    %c0_i32_0 = arith.constant 0 : i32
    %c0_i32_1 = arith.constant 0 : i32
    return %c0_i32, %c0_i32_0 : i32, i32
  }
  func.func @transform_7(%arg0: i32) -> (i32, i32) {
    %c0_i32 = arith.constant 0 : i32
    %c0_i32_0 = arith.constant 0 : i32
    %c0_i32_1 = arith.constant 0 : i32
    return %c0_i32, %c0_i32_0 : i32, i32
  }
  func.func @transform_8(%arg0: i32) -> (i32, i32) {
    %c0_i32 = arith.constant 0 : i32
    %c0_i32_0 = arith.constant 0 : i32
    %c0_i32_1 = arith.constant 0 : i32
    return %c0_i32, %c0_i32_0 : i32, i32
  }
  func.func @transform_9(%arg0: i32) -> (i32, i32) {
    %c0_i32 = arith.constant 0 : i32
    %c0_i32_0 = arith.constant 0 : i32
    return %arg0, %c0_i32 : i32, i32
  }
}

</mosaic_0001>

<bundles_post_ra>
// kernel: autoencoder_forward.1
= control target key start
LH: loop header
LB: loop body
LE: loop exit
PB: predicated region body
PF: predicated region fallthrough
CT: control target
= control target key end

     0   :  { %14 = vsyncpa [#allocation3], 0  ;;  %s4242_s0 = inlined_call_operand.vmem [shape: f32[2,1024], index: 0, kind: input, shape index: {}]   ;;  %s4243_s1 = inlined_call_operand.hbm [shape: bf16[1024,256], index: 1, kind: input, shape index: {}]   ;;  %s4244_s2 = inlined_call_operand.vmem [shape: f32[1,256], index: 2, kind: input, shape index: {}]   ;;  %s4245_s3 = inlined_call_operand.vmem [shape: bf16[256,128], index: 3, kind: input, shape index: {}]   ;;  %s4246_s4 = inlined_call_operand.vmem [shape: f32[1,128], index: 4, kind: input, shape index: {}]   ;;  %s4247_s5 = inlined_call_operand.hbm [shape: bf16[128,256], index: 5, kind: input, shape index: {}]   ;;  %s4248_s6 = inlined_call_operand.vmem [shape: f32[1,256], index: 6, kind: input, shape index: {}]   ;;  %s4249_s7 = inlined_call_operand.hbm [shape: bf16[256,1024], index: 7, kind: input, shape index: {}]   ;;  %s4250_s8 = inlined_call_operand.vmem [shape: f32[1,1024], index: 8, kind: input, shape index: {}]   ;;  %s4251_s9 = inlined_call_operand.vmem [shape: f32[2,1024], index: 9, kind: output, shape index: {}]  }
   0x1   :  { %15 = vsyncpa [#allocation5], 0  ;;  %s41_s11 = sshll.u32 %s4247_s5, 4  ;;  %s4025_s12 = smov [#allocation4]   ;;  %s42_s11 = int_to_ptr.hbm [resolvable:$true] %s41_s11 }
   0x2   :  { %s43_s13 = sshll.u32 %s4025_s12, 4  ;;  %s22_s16 = sshll.u32 %s4243_s1, 4  ;;  %s44_s13 = int_to_ptr.vmem [resolvable:$true] %s43_s13  ;;  %s23_s16 = int_to_ptr.hbm [resolvable:$true] %s22_s16 }
   0x3   :  { %s4026_s17 = smov 128   ;;  %s4027_s18 = smov 8  }
   0x4   :  { %49 = dma.hbm_to_vmem [thread:$0]  %s42_s11, 2048, %s44_s13, [#allocation5], %s4026_s17, %s4026_s17, %s4027_s18  }
   0x5   :  { %s4028_s19 = smov [#allocation2]   ;;  %s56_s23 = sshll.u32 %s4249_s7, 4  ;;  %s57_s23 = int_to_ptr.hbm [resolvable:$true] %s56_s23 }
   0x6   :  { %s24_s20 = sshll.u32 %s4028_s19, 4  ;;  %s4029_s5 = smov [#allocation6]   ;;  %s25_s20 = int_to_ptr.vmem [resolvable:$true] %s24_s20 }
   0x7   :  { %30 = dma.hbm_to_vmem [thread:$0]  %s23_s16, 16384, %s25_s20, [#allocation3], %s4026_s17, %s4026_s17, %s4027_s18  }
   0x8   :  { %s58_s24 = sshll.u32 %s4029_s5, 4  ;;  %s4030_s25 = smov 512   ;;  %s59_s24 = int_to_ptr.vmem [resolvable:$true] %s58_s24 }
   0x9   :  { %s4031_s26 = smov 32  }
   0xa   :  { %64 = dma.hbm_to_vmem [thread:$0]  %s57_s23, 16384, %s59_s24, [#allocation5], %s4030_s25, %s4030_s25, %s4031_s26  }
   0xb   :  { %4021 = dma.done.wait [#allocation3], 16384  }
   0xc   :  { %4022 = vsyncadd [#allocation3], 4294950912 }
   0xd   :  { %4023 = dma.done.wait [#allocation5], 18432  }
   0xe   :  { %4024 = vsyncadd [#allocation5], 4294948864  ;;  %v2559_v0 = vld [vmem:[#allocation2 + $0x70] sm:$0xf]  ;;  %v3668_v1 = vld [vmem:[#allocation2 + $0x74] sm:$0xf0] }
   0xf   :  { %v2623_v2 = vld [vmem:[#allocation2 + $0xf0] sm:$0xf]  ;;  %v2560_v3 = vor.u32 %v3668_v1, %v2559_v0  ;;  %v3684_v4 = vld [vmem:[#allocation2 + $0xf4] sm:$0xf0]  ;;  %v2551_v11 = vld [vmem:[#allocation2 + $0x60] sm:$0xf] }
  0x10   :  { %v2687_v5 = vld [vmem:[#allocation2 + $0x170] sm:$0xf]  ;;  %v3700_v6 = vld [vmem:[#allocation2 + $0x174] sm:$0xf0]  ;;  %v2624_v7 = vor.u32 %v3684_v4, %v2623_v2  ;;  %v3666_v13 = vld [vmem:[#allocation2 + $0x64] sm:$0xf0] }
  0x11   :  { %v2688_v8 = vor.u32 %v3700_v6, %v2687_v5  ;;  %v2751_v9 = vld [vmem:[#allocation2 + $0x1f0] sm:$0xf]  ;;  %v3716_v10 = vld [vmem:[#allocation2 + $0x1f4] sm:$0xf0]  ;;  %908 = vmatpush.bf16.msra.mxu0 %v2560_v3  ;;  %v2615_v14 = vld [vmem:[#allocation2 + $0xe0] sm:$0xf]  ;;  %v2552_v16 = vor.u32 %v3666_v13, %v2551_v11 }
  0x12   :  { %v2752_v12 = vor.u32 %v3716_v10, %v2751_v9  ;;  %v3682_v15 = vld [vmem:[#allocation2 + $0xe4] sm:$0xf0]  ;;  %921 = vmatpush.bf16.msra.mxu1 %v2624_v7  ;;  %v2679_v18 = vld [vmem:[#allocation2 + $0x160] sm:$0xf]  ;;  %v2543_v23 = vld [vmem:[#allocation2 + $0x50] sm:$0xf] }
  0x13   :  { %934 = vmatpush.bf16.msra.mxu2 %v2688_v8  ;;  %v2616_v17 = vor.u32 %v3682_v15, %v2615_v14  ;;  %v3698_v19 = vld [vmem:[#allocation2 + $0x164] sm:$0xf0]  ;;  %v2743_v20 = vld [vmem:[#allocation2 + $0x1e0] sm:$0xf]  ;;  %v3664_v24 = vld [vmem:[#allocation2 + $0x54] sm:$0xf0] }
  0x14   :  { %947 = vmatpush.bf16.msra.mxu3 %v2752_v12  ;;  %v2680_v21 = vor.u32 %v3698_v19, %v2679_v18  ;;  %v3714_v22 = vld [vmem:[#allocation2 + $0x1e4] sm:$0xf0]  ;;  %v2607_v26 = vld [vmem:[#allocation2 + $0xd0] sm:$0xf]  ;;  %v3680_v27 = vld [vmem:[#allocation2 + $0xd4] sm:$0xf0]  ;;  %v2544_v29 = vor.u32 %v3664_v24, %v2543_v23 }
  0x15   :  { %v2744_v25 = vor.u32 %v3714_v22, %v2743_v20  ;;  %v2671_v28 = vld [vmem:[#allocation2 + $0x150] sm:$0xf]  ;;  %909 = vmatpush.bf16.msra.mxu0 %v2552_v16  ;;  %v3696_v30 = vld [vmem:[#allocation2 + $0x154] sm:$0xf0]  ;;  %v2608_v33 = vor.u32 %v3680_v27, %v2607_v26  ;;  %v2535_v35 = vld [vmem:[#allocation2 + $0x40] sm:$0xf] }
  0x16   :  { %v2735_v31 = vld [vmem:[#allocation2 + $0x1d0] sm:$0xf]  ;;  %v3712_v32 = vld [vmem:[#allocation2 + $0x1d4] sm:$0xf0]  ;;  %922 = vmatpush.bf16.msra.mxu1 %v2616_v17  ;;  %v2672_v34 = vor.u32 %v3696_v30, %v2671_v28  ;;  %v3662_v36 = vld [vmem:[#allocation2 + $0x44] sm:$0xf0] }
  0x17   :  { %935 = vmatpush.bf16.msra.mxu2 %v2680_v21  ;;  %v2599_v37 = vld [vmem:[#allocation2 + $0xc0] sm:$0xf]  ;;  %v2736_v38 = vor.u32 %v3712_v32, %v2735_v31  ;;  %v3678_v39 = vld [vmem:[#allocation2 + $0xc4] sm:$0xf0]  ;;  %v2536_v44 = vor.u32 %v3662_v36, %v2535_v35  ;;  %v2527_v47 = vld [vmem:[#allocation2 + $0x30] sm:$0xf] }
  0x18   :  { %948 = vmatpush.bf16.msra.mxu3 %v2744_v25  ;;  %v2663_v40 = vld [vmem:[#allocation2 + $0x140] sm:$0xf]  ;;  %v3694_v41 = vld [vmem:[#allocation2 + $0x144] sm:$0xf0]  ;;  %v2600_v45 = vor.u32 %v3678_v39, %v2599_v37  ;;  %v3660_v48 = vld [vmem:[#allocation2 + $0x34] sm:$0xf0] }
  0x19   :  { %v2727_v42 = vld [vmem:[#allocation2 + $0x1c0] sm:$0xf]  ;;  %v3710_v43 = vld [vmem:[#allocation2 + $0x1c4] sm:$0xf0]  ;;  %910 = vmatpush.bf16.msra.mxu0 %v2544_v29  ;;  %v2664_v46 = vor.u32 %v3694_v41, %v2663_v40  ;;  %v2591_v49 = vld [vmem:[#allocation2 + $0xb0] sm:$0xf]  ;;  %v2528_v56 = vor.u32 %v3660_v48, %v2527_v47 }
  0x1a   :  { %923 = vmatpush.bf16.msra.mxu1 %v2608_v33  ;;  %v2728_v50 = vor.u32 %v3710_v43, %v2727_v42  ;;  %v3676_v51 = vld [vmem:[#allocation2 + $0xb4] sm:$0xf0]  ;;  %v2655_v52 = vld [vmem:[#allocation2 + $0x130] sm:$0xf]  ;;  %v2519_v59 = vld [vmem:[#allocation2 + $0x20] sm:$0xf] }
  0x1b   :  { %936 = vmatpush.bf16.msra.mxu2 %v2672_v34  ;;  %v3692_v53 = vld [vmem:[#allocation2 + $0x134] sm:$0xf0]  ;;  %v2719_v54 = vld [vmem:[#allocation2 + $0x1b0] sm:$0xf]  ;;  %v2592_v57 = vor.u32 %v3676_v51, %v2591_v49  ;;  %v3658_v60 = vld [vmem:[#allocation2 + $0x24] sm:$0xf0] }
  0x1c   :  { %949 = vmatpush.bf16.msra.mxu3 %v2736_v38  ;;  %v3708_v55 = vld [vmem:[#allocation2 + $0x1b4] sm:$0xf0]  ;;  %v2656_v58 = vor.u32 %v3692_v53, %v2655_v52  ;;  %v2583_v61 = vld [vmem:[#allocation2 + $0xa0] sm:$0xf]  ;;  %v3674_v63 = vld [vmem:[#allocation2 + $0xa4] sm:$0xf0]  ;;  %v2520_v4 = vor.u32 %v3658_v60, %v2519_v59 }
  0x1d   :  { %911 = vmatpush.bf16.msra.mxu0 %v2536_v44  ;;  %v2720_v62 = vor.u32 %v3708_v55, %v2719_v54  ;;  %v2647_v0 = vld [vmem:[#allocation2 + $0x120] sm:$0xf]  ;;  %v3690_v1 = vld [vmem:[#allocation2 + $0x124] sm:$0xf0]  ;;  %v2584_v5 = vor.u32 %v3674_v63, %v2583_v61  ;;  %v2511_v7 = vld [vmem:[#allocation2 + $0x10] sm:$0xf] }
  0x1e   :  { %924 = vmatpush.bf16.msra.mxu1 %v2600_v45  ;;  %v2711_v2 = vld [vmem:[#allocation2 + $0x1a0] sm:$0xf]  ;;  %v3706_v3 = vld [vmem:[#allocation2 + $0x1a4] sm:$0xf0]  ;;  %v2648_v6 = vor.u32 %v3690_v1, %v2647_v0  ;;  %v3656_v8 = vld [vmem:[#allocation2 + $0x14] sm:$0xf0] }
  0x1f   :  { %937 = vmatpush.bf16.msra.mxu2 %v2664_v46  ;;  %v2575_v9 = vld [vmem:[#allocation2 + $0x90] sm:$0xf]  ;;  %v2712_v10 = vor.u32 %v3706_v3, %v2711_v2  ;;  %v3672_v11 = vld [vmem:[#allocation2 + $0x94] sm:$0xf0]  ;;  %v2512_v16 = vor.u32 %v3656_v8, %v2511_v7  ;;  %v2503_v17 = vld [vmem:[#allocation2] sm:$0xf] }
  0x20   :  { %950 = vmatpush.bf16.msra.mxu3 %v2728_v50  ;;  %v2639_v12 = vld [vmem:[#allocation2 + $0x110] sm:$0xf]  ;;  %v3688_v13 = vld [vmem:[#allocation2 + $0x114] sm:$0xf0]  ;;  %v3654_v18 = vld [vmem:[#allocation2 + $0x4] sm:$0xf0]  ;;  %v2576_v19 = vor.u32 %v3672_v11, %v2575_v9 }
  0x21   :  { %912 = vmatpush.bf16.msra.mxu0 %v2528_v56  ;;  %v2703_v14 = vld [vmem:[#allocation2 + $0x190] sm:$0xf]  ;;  %v3704_v15 = vld [vmem:[#allocation2 + $0x194] sm:$0xf0]  ;;  %v2640_v20 = vor.u32 %v3688_v13, %v2639_v12  ;;  %v2567_v21 = vld [vmem:[#allocation2 + $0x80] sm:$0xf]  ;;  %v2504_v31 = vor.u32 %v3654_v18, %v2503_v17 }
  0x22   :  { %925 = vmatpush.bf16.msra.mxu1 %v2592_v57  ;;  %v3670_v22 = vld [vmem:[#allocation2 + $0x84] sm:$0xf0]  ;;  %v2631_v23 = vld [vmem:[#allocation2 + $0x100] sm:$0xf]  ;;  %v2704_v24 = vor.u32 %v3704_v15, %v2703_v14  ;;  %v2815_v28 = vld [vmem:[#allocation2 + $0x270] sm:$0xf] }
  0x23   :  { %938 = vmatpush.bf16.msra.mxu2 %v2656_v58  ;;  %v3686_v25 = vld [vmem:[#allocation2 + $0x104] sm:$0xf0]  ;;  %v2695_v26 = vld [vmem:[#allocation2 + $0x180] sm:$0xf]  ;;  %v3732_v29 = vld [vmem:[#allocation2 + $0x274] sm:$0xf0]  ;;  %v2568_v35 = vor.u32 %v3670_v22, %v2567_v21 }
  0x24   :  { %951 = vmatpush.bf16.msra.mxu3 %v2720_v62  ;;  %v3702_v27 = vld [vmem:[#allocation2 + $0x184] sm:$0xf0]  ;;  %v2879_v30 = vld [vmem:[#allocation2 + $0x2f0] sm:$0xf]  ;;  %v3748_v32 = vld [vmem:[#allocation2 + $0x2f4] sm:$0xf0]  ;;  %v2632_v36 = vor.u32 %v3686_v25, %v2631_v23  ;;  %v2816_v40 = vor.u32 %v3732_v29, %v2815_v28 }
  0x25   :  { %913 = vmatpush.bf16.msra.mxu0 %v2520_v4  ;;  %v2943_v33 = vld [vmem:[#allocation2 + $0x370] sm:$0xf]  ;;  %v3764_v34 = vld [vmem:[#allocation2 + $0x374] sm:$0xf0]  ;;  %v2696_v39 = vor.u32 %v3702_v27, %v2695_v26  ;;  %v2807_v41 = vld [vmem:[#allocation2 + $0x260] sm:$0xf]  ;;  %v2880_v43 = vor.u32 %v3748_v32, %v2879_v30 }
  0x26   :  { %926 = vmatpush.bf16.msra.mxu1 %v2584_v5  ;;  %v3007_v37 = vld [vmem:[#allocation2 + $0x3f0] sm:$0xf]  ;;  %v3780_v38 = vld [vmem:[#allocation2 + $0x3f4] sm:$0xf0]  ;;  %v3730_v42 = vld [vmem:[#allocation2 + $0x264] sm:$0xf0]  ;;  %v2944_v44 = vor.u32 %v3764_v34, %v2943_v33 }
  0x27   :  { %939 = vmatpush.bf16.msra.mxu2 %v2648_v6  ;;  %v2871_v45 = vld [vmem:[#allocation2 + $0x2e0] sm:$0xf]  ;;  %v3746_v46 = vld [vmem:[#allocation2 + $0x2e4] sm:$0xf0]  ;;  %v3008_v48 = vor.u32 %v3780_v38, %v3007_v37  ;;  %v2799_v52 = vld [vmem:[#allocation2 + $0x250] sm:$0xf]  ;;  %v2808_v56 = vor.u32 %v3730_v42, %v2807_v41 }
  0x28   :  { %952 = vmatpush.bf16.msra.mxu3 %v2712_v10  ;;  %v2935_v47 = vld [vmem:[#allocation2 + $0x360] sm:$0xf]  ;;  %v3762_v49 = vld [vmem:[#allocation2 + $0x364] sm:$0xf0]  ;;  %v79_v53 = vld [vmem:[%s4242_s0] sm:$0xff]  ;;  %v2872_v59 = vor.u32 %v3746_v46, %v2871_v45  ;;  %vm2420_vm0 = vcmask 1041408  }
  0x29   :  { %914 = vmatpush.bf16.msra.mxu0 %v2512_v16  ;;  %v2999_v50 = vld [vmem:[#allocation2 + $0x3e0] sm:$0xf]  ;;  %v3778_v51 = vld [vmem:[#allocation2 + $0x3e4] sm:$0xf0]  ;;  %v83_v55 = vld [vmem:[%s4242_s0 + $0x20] sm:$0xff]  ;;  %v2936_v60 = vor.u32 %v3762_v49, %v2935_v47  ;;  %vm2422_vm1 = vcmask 1045508  }
  0x2a   :  { %927 = vmatpush.bf16.msra.mxu1 %v2576_v19  ;;  %v81_v54 = vld [vmem:[%s4242_s0 + $0x10] sm:$0xff]  ;;  %v3728_v57 = vld [vmem:[#allocation2 + $0x254] sm:$0xf0]  ;;  %95 = vst [vmem:[#allocation1] ss:$4 sm:$0xff] %v79_v53  ;;  %v3000_v63 = vor.u32 %v3778_v51, %v2999_v50  ;;  %v80_v38 = vld [vmem:[%s4242_s0 + $0x8] sm:$0xff] }
  0x2b   :  { %940 = vmatpush.bf16.msra.mxu2 %v2640_v20  ;;  %v85_v58 = vld [vmem:[%s4242_s0 + $0x30] sm:$0xff]  ;;  %v2863_v61 = vld [vmem:[#allocation2 + $0x2d0] sm:$0xf]  ;;  %v3744_v62 = vld [vmem:[#allocation2 + $0x2d4] sm:$0xf0]  ;;  %v2800_v4 = vor.u32 %v3728_v57, %v2799_v52  ;;  %vm2424_vm2 = vcmask 1043456  }
  0x2c   :  { %953 = vmatpush.bf16.msra.mxu3 %v2704_v24  ;;  %97 = vst [vmem:[#allocation1 + $0x1] ss:$4 sm:$0xff] %v81_v54  ;;  %v2927_v0 = vld [vmem:[#allocation2 + $0x350] sm:$0xf]  ;;  %v3760_v1 = vld [vmem:[#allocation2 + $0x354] sm:$0xf0]  ;;  %v2864_v6 = vor.u32 %v3744_v62, %v2863_v61 }
  0x2d   :  { %915 = vmatpush.bf16.msra.mxu0 %v2504_v31  ;;  %99 = vst [vmem:[#allocation1 + $0x2] ss:$4 sm:$0xff] %v83_v55  ;;  %v2991_v2 = vld [vmem:[#allocation2 + $0x3d0] sm:$0xf]  ;;  %v3776_v3 = vld [vmem:[#allocation2 + $0x3d4] sm:$0xf0]  ;;  %v2928_v7 = vor.u32 %v3760_v1, %v2927_v0 }
  0x2e   :  { %928 = vmatpush.bf16.msra.mxu1 %v2568_v35  ;;  %101 = vst [vmem:[#allocation1 + $0x3] ss:$4 sm:$0xff] %v85_v58  ;;  %v2791_v5 = vld [vmem:[#allocation2 + $0x240] sm:$0xf]  ;;  %v3726_v8 = vld [vmem:[#allocation2 + $0x244] sm:$0xf0]  ;;  %v2992_v11 = vor.u32 %v3776_v3, %v2991_v2 }
  0x2f   :  { %941 = vmatpush.bf16.msra.mxu2 %v2632_v36  ;;  %v2855_v9 = vld [vmem:[#allocation2 + $0x2c0] sm:$0xf]  ;;  %v3742_v10 = vld [vmem:[#allocation2 + $0x2c4] sm:$0xf0]  ;;  %v2783_v16 = vld [vmem:[#allocation2 + $0x230] sm:$0xf]  ;;  %v2792_v18 = vor.u32 %v3726_v8, %v2791_v5 }
  0x30   :  { %954 = vmatpush.bf16.msra.mxu3 %v2696_v39  ;;  %v2919_v12 = vld [vmem:[#allocation2 + $0x340] sm:$0xf]  ;;  %v3758_v13 = vld [vmem:[#allocation2 + $0x344] sm:$0xf0]  ;;  %v3724_v17 = vld [vmem:[#allocation2 + $0x234] sm:$0xf0]  ;;  %v2856_v22 = vor.u32 %v3742_v10, %v2855_v9 }
  0x31   :  { %960 = vmatpush.bf16.msrb.mxu0 %v2816_v40  ;;  %v2983_v14 = vld [vmem:[#allocation2 + $0x3c0] sm:$0xf]  ;;  %v3774_v15 = vld [vmem:[#allocation2 + $0x3c4] sm:$0xf0]  ;;  %v2847_v19 = vld [vmem:[#allocation2 + $0x2b0] sm:$0xf]  ;;  %v2920_v23 = vor.u32 %v3758_v13, %v2919_v12  ;;  %v2784_v34 = vor.u32 %v3724_v17, %v2783_v16 }
  0x32   :  { %973 = vmatpush.bf16.msrb.mxu1 %v2880_v43  ;;  %v3740_v20 = vld [vmem:[#allocation2 + $0x2b4] sm:$0xf0]  ;;  %v2911_v21 = vld [vmem:[#allocation2 + $0x330] sm:$0xf]  ;;  %v2984_v27 = vor.u32 %v3774_v15, %v2983_v14  ;;  %v2775_v37 = vld [vmem:[#allocation2 + $0x220] sm:$0xf] }
  0x33   :  { %986 = vmatpush.bf16.msrb.mxu2 %v2944_v44  ;;  %v3756_v24 = vld [vmem:[#allocation2 + $0x334] sm:$0xf0]  ;;  %v2975_v25 = vld [vmem:[#allocation2 + $0x3b0] sm:$0xf]  ;;  %v2848_v39 = vor.u32 %v3740_v20, %v2847_v19  ;;  %v3722_v41 = vld [vmem:[#allocation2 + $0x224] sm:$0xf0] }
  0x34   :  { %999 = vmatpush.bf16.msrb.mxu3 %v3008_v48  ;;  %v3772_v26 = vld [vmem:[#allocation2 + $0x3b4] sm:$0xf0]  ;;  %v2912_v40 = vor.u32 %v3756_v24, %v2911_v21  ;;  %v2839_v42 = vld [vmem:[#allocation2 + $0x2a0] sm:$0xf]  ;;  %v3738_v43 = vld [vmem:[#allocation2 + $0x2a4] sm:$0xf0]  ;;  %v2776_v51 = vor.u32 %v3722_v41, %v2775_v37 }
  0x35   :  { %961 = vmatpush.bf16.msrb.mxu0 %v2808_v56  ;;  %v112_v28 = vld.sshfl [vmem:[#allocation1 + $0x10] sm:$0xff pattern:$0x73625140]  ;;  %v110_v29 = vld.sshfl [vmem:[#allocation1] sm:$0xff pattern:$0x73625140]  ;;  %v2976_v44 = vor.u32 %v3772_v26, %v2975_v25  ;;  %v2840_v55 = vor.u32 %v3738_v43, %v2839_v42 }
  0x36   :  { %974 = vmatpush.bf16.msrb.mxu1 %v2872_v59  ;;  %v4103_v30 = vpack.c.bf16 %v112_v28, %v112_v28  ;;  %v4105_v31 = vpack.c.bf16 %v110_v29, %v110_v29  ;;  %v113_v32 = vld.sshfl [vmem:[#allocation1 + $0x18] sm:$0xff pattern:$0x73625140]  ;;  %v111_v33 = vld.sshfl [vmem:[#allocation1 + $0x8] sm:$0xff pattern:$0x73625140] }
  0x37   :  { %987 = vmatpush.bf16.msrb.mxu2 %v2936_v60  ;;  %v4107_v35 = vpack.c.bf16 %v113_v32, %v113_v32  ;;  %v4109_v36 = vpack.c.bf16 %v111_v33, %v111_v33  ;;  %v2903_v45 = vld [vmem:[#allocation2 + $0x320] sm:$0xf]  ;;  %v3754_v46 = vld [vmem:[#allocation2 + $0x324] sm:$0xf0]  ;;  %v2767_v49 = vld [vmem:[#allocation2 + $0x210] sm:$0xf] }
  0x38   :  { %1000 = vmatpush.bf16.msrb.mxu3 %v3000_v63  ;;  %942 = vmatmul.bf16.vlgmr.msra.gmra.mxu2 %v4103_v30  ;;  %v2967_v47 = vld [vmem:[#allocation2 + $0x3a0] sm:$0xf]  ;;  %v3770_v48 = vld [vmem:[#allocation2 + $0x3a4] sm:$0xf0]  ;;  %v3720_v50 = vld [vmem:[#allocation2 + $0x214] sm:$0xf0]  ;;  %v2904_v56 = vor.u32 %v3754_v46, %v2903_v45 }
  0x39   :  { %962 = vmatpush.bf16.msrb.mxu0 %v2800_v4  ;;  %955 = vmatmul.bf16.vlgmr.msra.gmra.mxu3 %v4107_v35  ;;  %v2831_v52 = vld [vmem:[#allocation2 + $0x290] sm:$0xf]  ;;  %v3736_v53 = vld [vmem:[#allocation2 + $0x294] sm:$0xf0]  ;;  %v84_v58 = vld [vmem:[%s4242_s0 + $0x28] sm:$0xff]  ;;  %v2968_v60 = vor.u32 %v3770_v48, %v2967_v47  ;;  %v2768_v1 = vor.u32 %v3720_v50, %v2767_v49 }
  0x3a   :  { %975 = vmatpush.bf16.msrb.mxu1 %v2864_v6  ;;  %916 = vmatmul.bf16.vlgmr.msra.gmra.mxu0 %v4105_v31  ;;  %v2895_v54 = vld [vmem:[#allocation2 + $0x310] sm:$0xf]  ;;  %103 = vst [vmem:[#allocation1 + $0x20] ss:$4 sm:$0xff] %v80_v38  ;;  %v3752_v61 = vld [vmem:[#allocation2 + $0x314] sm:$0xf0]  ;;  %v2832_v4 = vor.u32 %v3736_v53, %v2831_v52 }
  0x3b   :  { %988 = vmatpush.bf16.msrb.mxu2 %v2928_v7  ;;  %929 = vmatmul.bf16.vlgmr.msra.gmra.mxu1 %v4109_v36  ;;  %v82_v57 = vld [vmem:[%s4242_s0 + $0x18] sm:$0xff]  ;;  %v3768_v63 = vld [vmem:[#allocation2 + $0x394] sm:$0xf0]  ;;  %v2759_v0 = vld [vmem:[#allocation2 + $0x200] sm:$0xf]  ;;  %v2896_v5 = vor.u32 %v3752_v61, %v2895_v54 }
  0x3c   :  { %1001 = vmatpush.bf16.msrb.mxu3 %v2992_v11  ;;  %v86_v59 = vld [vmem:[%s4242_s0 + $0x38] sm:$0xff]  ;;  %105 = vst [vmem:[#allocation1 + $0x21] ss:$4 sm:$0xff] %v82_v57  ;;  %v3718_v2 = vld [vmem:[#allocation2 + $0x204] sm:$0xf0] }
  0x3d   :  { %963 = vmatpush.bf16.msrb.mxu0 %v2792_v18  ;;  %v2959_v62 = vld [vmem:[#allocation2 + $0x390] sm:$0xf]  ;;  %107 = vst [vmem:[#allocation1 + $0x22] ss:$4 sm:$0xff] %v84_v58  ;;  %v2823_v3 = vld [vmem:[#allocation2 + $0x280] sm:$0xf]  ;;  %v2760_v16 = vor.u32 %v3718_v2, %v2759_v0 }
  0x3e   :  { %976 = vmatpush.bf16.msrb.mxu1 %v2856_v22  ;;  %109 = vst [vmem:[#allocation1 + $0x23] ss:$4 sm:$0xff] %v86_v59  ;;  %v3734_v6 = vld [vmem:[#allocation2 + $0x284] sm:$0xf0]  ;;  %v2887_v7 = vld [vmem:[#allocation2 + $0x300] sm:$0xf]  ;;  %v2960_v9 = vor.u32 %v3768_v63, %v2959_v62 }
  0x3f   :  { %989 = vmatpush.bf16.msrb.mxu2 %v2920_v23  ;;  %v3750_v8 = vld [vmem:[#allocation2 + $0x304] sm:$0xf0]  ;;  %v2951_v10 = vld [vmem:[#allocation2 + $0x380] sm:$0xf]  ;;  %v3667_v12 = vld [vmem:[#allocation2 + $0x74] sm:$0xf]  ;;  %v2824_v20 = vor.u32 %v3734_v6, %v2823_v3 }
  0x40   :  { %1002 = vmatpush.bf16.msrb.mxu3 %v2984_v27  ;;  %v3766_v11 = vld [vmem:[#allocation2 + $0x384] sm:$0xf0]  ;;  %v2561_v13 = vld [vmem:[#allocation2 + $0x78] sm:$0xf0]  ;;  %v3683_v14 = vld [vmem:[#allocation2 + $0xf4] sm:$0xf]  ;;  %v2888_v21 = vor.u32 %v3750_v8, %v2887_v7 }
  0x41   :  { %964 = vmatpush.bf16.msrb.mxu0 %v2784_v34  ;;  %v2625_v15 = vld [vmem:[#allocation2 + $0xf8] sm:$0xf0]  ;;  %v3699_v17 = vld [vmem:[#allocation2 + $0x174] sm:$0xf]  ;;  %v3665_v23 = vld [vmem:[#allocation2 + $0x64] sm:$0xf]  ;;  %v2952_v25 = vor.u32 %v3766_v11, %v2951_v10  ;;  %v2564_v26 = vor.u32 %v3667_v12, %v2561_v13 }
  0x42   :  { %977 = vmatpush.bf16.msrb.mxu1 %v2848_v39  ;;  %v2689_v18 = vld [vmem:[#allocation2 + $0x178] sm:$0xf0]  ;;  %v3715_v19 = vld [vmem:[#allocation2 + $0x1f4] sm:$0xf]  ;;  %v2553_v24 = vld [vmem:[#allocation2 + $0x68] sm:$0xf0]  ;;  %v2628_v33 = vor.u32 %v3683_v14, %v2625_v15 }
  0x43   :  { %990 = vmatpush.bf16.msrb.mxu2 %v2912_v40  ;;  %v2753_v22 = vld [vmem:[#allocation2 + $0x1f8] sm:$0xf0]  ;;  %v3681_v27 = vld [vmem:[#allocation2 + $0xe4] sm:$0xf]  ;;  %v2617_v28 = vld [vmem:[#allocation2 + $0xe8] sm:$0xf0]  ;;  %v2692_v34 = vor.u32 %v3699_v17, %v2689_v18  ;;  %v2556_v47 = vor.u32 %v3665_v23, %v2553_v24 }
  0x44   :  { %1003 = vmatpush.bf16.msrb.mxu3 %v2976_v44  ;;  %v3697_v29 = vld [vmem:[#allocation2 + $0x164] sm:$0xf]  ;;  %v2681_v32 = vld [vmem:[#allocation2 + $0x168] sm:$0xf0]  ;;  %v2756_v39 = vor.u32 %v3715_v19, %v2753_v22  ;;  %v2620_v49 = vor.u32 %v3681_v27, %v2617_v28  ;;  %v2545_v52 = vld [vmem:[#allocation2 + $0x58] sm:$0xf0] }
  0x45   :  { %965 = vmatpush.bf16.msrb.mxu0 %v2776_v51  ;;  %v116_v37 = vld.sshfl [vmem:[#allocation1 + $0x30] sm:$0xff pattern:$0x73625140]  ;;  %v114_v38 = vld.sshfl [vmem:[#allocation1 + $0x20] sm:$0xff pattern:$0x73625140]  ;;  %v2684_v50 = vor.u32 %v3697_v29, %v2681_v32 }
  0x46   :  { %978 = vmatpush.bf16.msrb.mxu1 %v2840_v55  ;;  %v4127_v40 = vpack.c.bf16 %v116_v37, %v116_v37  ;;  %v117_v41 = vld.sshfl [vmem:[#allocation1 + $0x38] sm:$0xff pattern:$0x73625140]  ;;  %v115_v42 = vld.sshfl [vmem:[#allocation1 + $0x28] sm:$0xff pattern:$0x73625140]  ;;  %v4129_v43 = vpack.c.bf16 %v114_v38, %v114_v38 }
  0x47   :  { %991 = vmatpush.bf16.msrb.mxu2 %v2904_v56  ;;  %v4131_v44 = vpack.c.bf16 %v117_v41, %v117_v41  ;;  %v3713_v45 = vld [vmem:[#allocation2 + $0x1e4] sm:$0xf]  ;;  %v2745_v46 = vld [vmem:[#allocation2 + $0x1e8] sm:$0xf0]  ;;  %v4133_v48 = vpack.c.bf16 %v115_v42, %v115_v42  ;;  %v3663_v51 = vld [vmem:[#allocation2 + $0x54] sm:$0xf] }
  0x48   :  { %1004 = vmatpush.bf16.msrb.mxu3 %v2968_v60  ;;  %v3679_v53 = vld [vmem:[#allocation2 + $0xd4] sm:$0xf]  ;;  %v2748_v54 = vor.u32 %v3713_v45, %v2745_v46  ;;  %v2609_v55 = vld [vmem:[#allocation2 + $0xd8] sm:$0xf0]  ;;  %v2548_v60 = vor.u32 %v3663_v51, %v2545_v52  ;;  %v3661_v63 = vld [vmem:[#allocation2 + $0x44] sm:$0xf] }
  0x49   :  { %966 = vmatpush.bf16.msrb.mxu0 %v2768_v1  ;;  %v3695_v56 = vld [vmem:[#allocation2 + $0x154] sm:$0xf]  ;;  %v2673_v57 = vld [vmem:[#allocation2 + $0x158] sm:$0xf0]  ;;  %v2612_v61 = vor.u32 %v3679_v53, %v2609_v55  ;;  %v2537_v0 = vld [vmem:[#allocation2 + $0x48] sm:$0xf0] }
  0x4a   :  { %979 = vmatpush.bf16.msrb.mxu1 %v2832_v4  ;;  %v3711_v58 = vld [vmem:[#allocation2 + $0x1d4] sm:$0xf]  ;;  %v2737_v59 = vld [vmem:[#allocation2 + $0x1d8] sm:$0xf0]  ;;  %v2676_v62 = vor.u32 %v3695_v56, %v2673_v57  ;;  %v3677_v1 = vld [vmem:[#allocation2 + $0xc4] sm:$0xf]  ;;  %v2540_v8 = vor.u32 %v3661_v63, %v2537_v0 }
  0x4b   :  { %992 = vmatpush.bf16.msrb.mxu2 %v2896_v5  ;;  %v2740_v2 = vor.u32 %v3711_v58, %v2737_v59  ;;  %v2601_v3 = vld [vmem:[#allocation2 + $0xc8] sm:$0xf0]  ;;  %v3693_v4 = vld [vmem:[#allocation2 + $0x144] sm:$0xf]  ;;  %v3659_v11 = vld [vmem:[#allocation2 + $0x34] sm:$0xf] }
  0x4c   :  { %1005 = vmatpush.bf16.msrb.mxu3 %v2960_v9  ;;  %v2665_v5 = vld [vmem:[#allocation2 + $0x148] sm:$0xf0]  ;;  %v3709_v6 = vld [vmem:[#allocation2 + $0x1c4] sm:$0xf]  ;;  %v2604_v9 = vor.u32 %v3677_v1, %v2601_v3  ;;  %v2529_v12 = vld [vmem:[#allocation2 + $0x38] sm:$0xf0] }
  0x4d   :  { %967 = vmatpush.bf16.msrb.mxu0 %v2760_v16  ;;  %v2729_v7 = vld [vmem:[#allocation2 + $0x1c8] sm:$0xf0]  ;;  %v2668_v10 = vor.u32 %v3693_v4, %v2665_v5  ;;  %v3675_v13 = vld [vmem:[#allocation2 + $0xb4] sm:$0xf]  ;;  %v2593_v15 = vld [vmem:[#allocation2 + $0xb8] sm:$0xf0] }
  0x4e   :  { %980 = vmatpush.bf16.msrb.mxu1 %v2824_v20  ;;  %v2732_v14 = vor.u32 %v3709_v6, %v2729_v7  ;;  %v3691_v16 = vld [vmem:[#allocation2 + $0x134] sm:$0xf]  ;;  %v2657_v17 = vld [vmem:[#allocation2 + $0x138] sm:$0xf0]  ;;  %v2532_v20 = vor.u32 %v3659_v11, %v2529_v12  ;;  %v3657_v23 = vld [vmem:[#allocation2 + $0x24] sm:$0xf] }
  0x4f   :  { %993 = vmatpush.bf16.msrb.mxu2 %v2888_v21  ;;  %v3707_v18 = vld [vmem:[#allocation2 + $0x1b4] sm:$0xf]  ;;  %v2721_v19 = vld [vmem:[#allocation2 + $0x1b8] sm:$0xf0]  ;;  %v2596_v21 = vor.u32 %v3675_v13, %v2593_v15  ;;  %v2660_v22 = vor.u32 %v3691_v16, %v2657_v17  ;;  %v2521_v24 = vld [vmem:[#allocation2 + $0x28] sm:$0xf0] }
  0x50   :  { %1006 = vmatpush.bf16.msrb.mxu3 %v2952_v25  ;;  %968 = vmatmul.bf16.vlgmr.msrb.gmra.mxu0 %v4129_v43  ;;  %v3673_v25 = vld [vmem:[#allocation2 + $0xa4] sm:$0xf]  ;;  %v2585_v27 = vld [vmem:[#allocation2 + $0xa8] sm:$0xf0]  ;;  %v2513_v41 = vld [vmem:[#allocation2 + $0x18] sm:$0xf0] }
  0x51   :  { %1012 = vmatpush.bf16.msra.mxu0 %v2564_v26  ;;  %981 = vmatmul.bf16.vlgmr.msrb.gmra.mxu1 %v4133_v48  ;;  %v2724_v26 = vor.u32 %v3707_v18, %v2721_v19  ;;  %v3689_v28 = vld [vmem:[#allocation2 + $0x124] sm:$0xf]  ;;  %v2649_v29 = vld [vmem:[#allocation2 + $0x128] sm:$0xf0]  ;;  %v2588_v37 = vor.u32 %v3673_v25, %v2585_v27  ;;  %v3671_v42 = vld [vmem:[#allocation2 + $0x94] sm:$0xf] }
  0x52   :  { %1025 = vmatpush.bf16.msra.mxu1 %v2628_v33  ;;  %994 = vmatmul.bf16.vlgmr.msrb.gmra.mxu2 %v4127_v40  ;;  %v3705_v32 = vld [vmem:[#allocation2 + $0x1a4] sm:$0xf]  ;;  %v2713_v33 = vld [vmem:[#allocation2 + $0x1a8] sm:$0xf0]  ;;  %v2652_v38 = vor.u32 %v3689_v28, %v2649_v29  ;;  %v2577_v46 = vld [vmem:[#allocation2 + $0x98] sm:$0xf0] }
  0x53   :  { %1038 = vmatpush.bf16.msra.mxu2 %v2692_v34  ;;  %1007 = vmatmul.bf16.vlgmr.msrb.gmra.mxu3 %v4131_v44  ;;  %v2524_v34 = vor.u32 %v3657_v23, %v2521_v24  ;;  %v2716_v45 = vor.u32 %v3705_v32, %v2713_v33  ;;  %v2705_v51 = vld [vmem:[#allocation2 + $0x198] sm:$0xf0]  ;;  %v3653_v53 = vld [vmem:[#allocation2 + $0x4] sm:$0xf]  ;;  %v2580_v55 = vor.u32 %v3671_v42, %v2577_v46  ;;  %v2569_v58 = vld [vmem:[#allocation2 + $0x88] sm:$0xf0] }
  0x54   :  { %1051 = vmatpush.bf16.msra.mxu3 %v2756_v39  ;;  %v3655_v39 = vld [vmem:[#allocation2 + $0x14] sm:$0xf]  ;;  %v3669_v57 = vld [vmem:[#allocation2 + $0x84] sm:$0xf]  ;;  %v2697_v63 = vld [vmem:[#allocation2 + $0x188] sm:$0xf0] }
  0x55   :  { %1013 = vmatpush.bf16.msra.mxu0 %v2556_v47  ;;  %v3687_v47 = vld [vmem:[#allocation2 + $0x114] sm:$0xf]  ;;  %v2516_v52 = vor.u32 %v3655_v39, %v2513_v41  ;;  %v3685_v59 = vld [vmem:[#allocation2 + $0x104] sm:$0xf]  ;;  %v2817_v1 = vld [vmem:[#allocation2 + $0x278] sm:$0xf0]  ;;  %v2572_v7 = vor.u32 %v3669_v57, %v2569_v58 }
  0x56   :  { %1026 = vmatpush.bf16.msra.mxu1 %v2620_v49  ;;  %v2641_v49 = vld [vmem:[#allocation2 + $0x118] sm:$0xf0]  ;;  %v3731_v0 = vld [vmem:[#allocation2 + $0x274] sm:$0xf]  ;;  %v3729_v15 = vld [vmem:[#allocation2 + $0x264] sm:$0xf] }
  0x57   :  { %1039 = vmatpush.bf16.msra.mxu2 %v2684_v50  ;;  %v3703_v50 = vld [vmem:[#allocation2 + $0x194] sm:$0xf]  ;;  %v2644_v56 = vor.u32 %v3687_v47, %v2641_v49  ;;  %v2881_v4 = vld [vmem:[#allocation2 + $0x2f8] sm:$0xf0]  ;;  %v2820_v12 = vor.u32 %v3731_v0, %v2817_v1  ;;  %v2809_v16 = vld [vmem:[#allocation2 + $0x268] sm:$0xf0] }
  0x58   :  { %1052 = vmatpush.bf16.msra.mxu3 %v2748_v54  ;;  %v2505_v54 = vld [vmem:[#allocation2 + $0x8] sm:$0xf0]  ;;  %v3763_v5 = vld [vmem:[#allocation2 + $0x374] sm:$0xf]  ;;  %v2945_v6 = vld [vmem:[#allocation2 + $0x378] sm:$0xf0]  ;;  %v2812_v24 = vor.u32 %v3729_v15, %v2809_v16 }
  0x59   :  { %1014 = vmatpush.bf16.msra.mxu0 %v2548_v60  ;;  %v2708_v60 = vor.u32 %v3703_v50, %v2705_v51  ;;  %v2508_v3 = vor.u32 %v3653_v53, %v2505_v54  ;;  %v3745_v17 = vld [vmem:[#allocation2 + $0x2e4] sm:$0xf]  ;;  %v2873_v19 = vld [vmem:[#allocation2 + $0x2e8] sm:$0xf0]  ;;  %v3727_v25 = vld [vmem:[#allocation2 + $0x254] sm:$0xf] }
  0x5a   :  { %1027 = vmatpush.bf16.msra.mxu1 %v2612_v61  ;;  %v2633_v61 = vld [vmem:[#allocation2 + $0x108] sm:$0xf0]  ;;  %v2801_v28 = vld [vmem:[#allocation2 + $0x258] sm:$0xf0]  ;;  %v3743_v29 = vld [vmem:[#allocation2 + $0x2d4] sm:$0xf] }
  0x5b   :  { %1040 = vmatpush.bf16.msra.mxu2 %v2676_v62  ;;  %v3701_v62 = vld [vmem:[#allocation2 + $0x184] sm:$0xf]  ;;  %v3001_v23 = vld [vmem:[#allocation2 + $0x3e8] sm:$0xf0]  ;;  %v2865_v33 = vld [vmem:[#allocation2 + $0x2d8] sm:$0xf0]  ;;  %v2804_v41 = vor.u32 %v3727_v25, %v2801_v28 }
  0x5c   :  { %1053 = vmatpush.bf16.msra.mxu3 %v2740_v2  ;;  %v3747_v2 = vld [vmem:[#allocation2 + $0x2f4] sm:$0xf]  ;;  %v2700_v11 = vor.u32 %v3701_v62, %v2697_v63  ;;  %v2993_v39 = vld [vmem:[#allocation2 + $0x3d8] sm:$0xf0]  ;;  %v2868_v42 = vor.u32 %v3743_v29, %v2865_v33  ;;  %v3725_v46 = vld [vmem:[#allocation2 + $0x244] sm:$0xf] }
  0x5d   :  { %1015 = vmatpush.bf16.msra.mxu0 %v2540_v8  ;;  %v2636_v8 = vor.u32 %v3685_v59, %v2633_v61  ;;  %v2884_v13 = vor.u32 %v3747_v2, %v2881_v4  ;;  %v2793_v47 = vld [vmem:[#allocation2 + $0x248] sm:$0xf0]  ;;  %v3757_v51 = vld [vmem:[#allocation2 + $0x344] sm:$0xf]  ;;  %v3739_v57 = vld [vmem:[#allocation2 + $0x2b4] sm:$0xf] }
  0x5e   :  { %1028 = vmatpush.bf16.msra.mxu1 %v2604_v9  ;;  %v3779_v9 = vld [vmem:[#allocation2 + $0x3f4] sm:$0xf]  ;;  %v2857_v50 = vld [vmem:[#allocation2 + $0x2c8] sm:$0xf0]  ;;  %v3773_v53 = vld [vmem:[#allocation2 + $0x3c4] sm:$0xf] }
  0x5f   :  { %1041 = vmatpush.bf16.msra.mxu2 %v2668_v10  ;;  %v3009_v10 = vld [vmem:[#allocation2 + $0x3f8] sm:$0xf0]  ;;  %v3771_v62 = vld [vmem:[#allocation2 + $0x3b4] sm:$0xf]  ;;  %v2777_v4 = vld [vmem:[#allocation2 + $0x228] sm:$0xf0] }
  0x60   :  { %1054 = vmatpush.bf16.msra.mxu3 %v2732_v14  ;;  %v2948_v14 = vor.u32 %v3763_v5, %v2945_v6  ;;  %v3012_v18 = vor.u32 %v3779_v9, %v3009_v10  ;;  %v2849_v59 = vld [vmem:[#allocation2 + $0x2b8] sm:$0xf0]  ;;  %v3737_v5 = vld [vmem:[#allocation2 + $0x2a4] sm:$0xf]  ;;  %v2905_v9 = vld [vmem:[#allocation2 + $0x328] sm:$0xf0] }
  0x61   :  { %1016 = vmatpush.bf16.msra.mxu0 %v2532_v20  ;;  %v3761_v20 = vld [vmem:[#allocation2 + $0x364] sm:$0xf]  ;;  %v2913_v61 = vld [vmem:[#allocation2 + $0x338] sm:$0xf0]  ;;  %v2852_v1 = vor.u32 %v3739_v57, %v2849_v59  ;;  %v3719_v15 = vld [vmem:[#allocation2 + $0x214] sm:$0xf] }
  0x62   :  { %1029 = vmatpush.bf16.msra.mxu1 %v2596_v21  ;;  %v2937_v21 = vld [vmem:[#allocation2 + $0x368] sm:$0xf0]  ;;  %v2977_v63 = vld [vmem:[#allocation2 + $0x3b8] sm:$0xf0]  ;;  %v3769_v10 = vld [vmem:[#allocation2 + $0x3a4] sm:$0xf] }
  0x63   :  { %1042 = vmatpush.bf16.msra.mxu2 %v2660_v22  ;;  %v3777_v22 = vld [vmem:[#allocation2 + $0x3e4] sm:$0xf]  ;;  %v2940_v27 = vor.u32 %v3761_v20, %v2937_v21  ;;  %v2980_v6 = vor.u32 %v3771_v62, %v2977_v63  ;;  %v2769_v16 = vld [vmem:[#allocation2 + $0x218] sm:$0xf0]  ;;  %v3751_v20 = vld [vmem:[#allocation2 + $0x314] sm:$0xf] }
  0x64   :  { %1055 = vmatpush.bf16.msra.mxu3 %v2724_v26  ;;  %v2876_v26 = vor.u32 %v3745_v17, %v2873_v19  ;;  %v3004_v32 = vor.u32 %v3777_v22, %v3001_v23  ;;  %v3735_v17 = vld [vmem:[#allocation2 + $0x294] sm:$0xf]  ;;  %v2833_v19 = vld [vmem:[#allocation2 + $0x298] sm:$0xf0]  ;;  %v2761_v28 = vld [vmem:[#allocation2 + $0x208] sm:$0xf0] }
  0x65   :  { %1017 = vmatpush.bf16.msra.mxu0 %v2524_v34  ;;  %v3759_v34 = vld [vmem:[#allocation2 + $0x354] sm:$0xf]  ;;  %v2897_v21 = vld [vmem:[#allocation2 + $0x318] sm:$0xf0]  ;;  %v2836_v25 = vor.u32 %v3735_v17, %v2833_v19  ;;  %v3733_v29 = vld [vmem:[#allocation2 + $0x284] sm:$0xf] }
  0x66   :  { %1030 = vmatpush.bf16.msra.mxu1 %v2588_v37  ;;  %v2929_v37 = vld [vmem:[#allocation2 + $0x358] sm:$0xf0]  ;;  %v3767_v22 = vld [vmem:[#allocation2 + $0x394] sm:$0xf]  ;;  %v2825_v33 = vld [vmem:[#allocation2 + $0x288] sm:$0xf0] }
  0x67   :  { %1043 = vmatpush.bf16.msra.mxu2 %v2652_v38  ;;  %v3775_v38 = vld [vmem:[#allocation2 + $0x3d4] sm:$0xf]  ;;  %v2961_v23 = vld [vmem:[#allocation2 + $0x398] sm:$0xf0]  ;;  %v3791_v17 = vld [vmem:[%s4245_s3 + $0x50] sm:$0xff] }
  0x68   :  { %1056 = vmatpush.bf16.msra.mxu3 %v2716_v45  ;;  %v2932_v45 = vor.u32 %v3759_v34, %v2929_v37  ;;  %v2996_v49 = vor.u32 %v3775_v38, %v2993_v39  ;;  %v3749_v34 = vld [vmem:[#allocation2 + $0x304] sm:$0xf]  ;;  %v2889_v37 = vld [vmem:[#allocation2 + $0x308] sm:$0xf0] }
  0x69   :  { %1018 = vmatpush.bf16.msra.mxu0 %v2516_v52  ;;  %v2921_v52 = vld [vmem:[#allocation2 + $0x348] sm:$0xf0]  ;;  %v3765_v38 = vld [vmem:[#allocation2 + $0x384] sm:$0xf] }
  0x6a   :  { %1031 = vmatpush.bf16.msra.mxu1 %v2580_v55  ;;  %v3723_v55 = vld [vmem:[#allocation2 + $0x234] sm:$0xf]  ;;  %v2953_v39 = vld [vmem:[#allocation2 + $0x388] sm:$0xf0] }
  0x6b   :  { %1044 = vmatpush.bf16.msra.mxu2 %v2644_v56  ;;  %v2785_v56 = vld [vmem:[#allocation2 + $0x238] sm:$0xf0] }
  0x6c   :  { %1057 = vmatpush.bf16.msra.mxu3 %v2708_v60  ;;  %v3755_v60 = vld [vmem:[#allocation2 + $0x334] sm:$0xf]  ;;  %v2788_v0 = vor.u32 %v3723_v55, %v2785_v56 }
  0x6d   :  { %1019 = vmatpush.bf16.msra.mxu0 %v2508_v3  ;;  %v2916_v2 = vor.u32 %v3755_v60, %v2913_v61  ;;  %v3721_v3 = vld [vmem:[#allocation2 + $0x224] sm:$0xf] }
  0x6e   :  { %1032 = vmatpush.bf16.msra.mxu1 %v2572_v7  ;;  %v2841_v7 = vld [vmem:[#allocation2 + $0x2a8] sm:$0xf0] }
  0x6f   :  { %1045 = vmatpush.bf16.msra.mxu2 %v2636_v8  ;;  %v3753_v8 = vld [vmem:[#allocation2 + $0x324] sm:$0xf] }
  0x70   :  { %1058 = vmatpush.bf16.msra.mxu3 %v2700_v11  ;;  %1020 = vmatmul.bf16.vlgmr.msra.gmra.mxu0 %v4105_v31  ;;  %v2985_v31 = vld [vmem:[#allocation2 + $0x3c8] sm:$0xf0] }
  0x71   :  { %1064 = vmatpush.bf16.msrb.mxu0 %v2820_v12  ;;  %1033 = vmatmul.bf16.vlgmr.msra.gmra.mxu1 %v4109_v36  ;;  %v2924_v36 = vor.u32 %v3757_v51, %v2921_v52  ;;  %v2988_v58 = vor.u32 %v3773_v53, %v2985_v31  ;;  %v2969_v11 = vld [vmem:[#allocation2 + $0x3a8] sm:$0xf0]  ;;  %v2780_v12 = vor.u32 %v3721_v3, %v2777_v4  ;;  %v3781_v51 = vld [vmem:[%s4245_s3] sm:$0xff] }
  0x72   :  { %1077 = vmatpush.bf16.msrb.mxu1 %v2884_v13  ;;  %1046 = vmatmul.bf16.vlgmr.msra.gmra.mxu2 %v4103_v30  ;;  %v3741_v30 = vld [vmem:[#allocation2 + $0x2c4] sm:$0xf]  ;;  %v2844_v13 = vor.u32 %v3737_v5, %v2841_v7  ;;  %v3796_v5 = vld [vmem:[%s4245_s3 + $0x78] sm:$0xff] }
  0x73   :  { %1090 = vmatpush.bf16.msrb.mxu2 %v2948_v14  ;;  %1059 = vmatmul.bf16.vlgmr.msra.gmra.mxu3 %v4107_v35  ;;  %v2796_v35 = vor.u32 %v3725_v46, %v2793_v47  ;;  %v2860_v54 = vor.u32 %v3741_v30, %v2857_v50  ;;  %v2908_v14 = vor.u32 %v3753_v8, %v2905_v9  ;;  %v3788_v47 = vld [vmem:[%s4245_s3 + $0x38] sm:$0xff]  ;;  %v3787_v30 = vld [vmem:[%s4245_s3 + $0x30] sm:$0xff]  ;;  %v262_v50 = vld [vmem:[%s4244_s2] sm:$0x3] }
  0x74   :  { %1103 = vmatpush.bf16.msrb.mxu3 %v3012_v18  ;;  %v2972_v18 = vor.u32 %v3769_v10, %v2969_v11  ;;  %v2956_v46 = vor.u32 %v3765_v38, %v2953_v39  ;;  %v264_v52 = vperm.slane %v262_v50, 0  ;;  %v3795_v8 = vld [vmem:[%s4245_s3 + $0x70] sm:$0xff] }
  0x75   :  { %1065 = vmatpush.bf16.msrb.mxu0 %v2812_v24  ;;  %v2772_v24 = vor.u32 %v3719_v15, %v2769_v16  ;;  %v3793_v15 = vld [vmem:[%s4245_s3 + $0x60] sm:$0xff]  ;;  %v3792_v16 = vld [vmem:[%s4245_s3 + $0x58] sm:$0xff] }
  0x76   :  { %1078 = vmatpush.bf16.msrb.mxu1 %v2876_v26  ;;  %v2900_v26 = vor.u32 %v3751_v20, %v2897_v21  ;;  %v3790_v20 = vld [vmem:[%s4245_s3 + $0x48] sm:$0xff] }
  0x77   :  { %1091 = vmatpush.bf16.msrb.mxu2 %v2940_v27  ;;  %v3717_v27 = vld [vmem:[#allocation2 + $0x204] sm:$0xf] }
  0x78   :  { %1104 = vmatpush.bf16.msrb.mxu3 %v3004_v32  ;;  %v2964_v32 = vor.u32 %v3767_v22, %v2961_v23 }
  0x79   :  { %1066 = vmatpush.bf16.msrb.mxu0 %v2804_v41  ;;  %v2764_v41 = vor.u32 %v3717_v27, %v2761_v28 }
  0x7a   :  { %1079 = vmatpush.bf16.msrb.mxu1 %v2868_v42  ;;  %v2828_v42 = vor.u32 %v3733_v29, %v2825_v33 }
  0x7b   :  { %1092 = vmatpush.bf16.msrb.mxu2 %v2932_v45  ;;  %v2892_v45 = vor.u32 %v3749_v34, %v2889_v37 }
  0x7c   :  { %1105 = vmatpush.bf16.msrb.mxu3 %v2996_v49  ;;  %v3786_v49 = vld [vmem:[%s4245_s3 + $0x28] sm:$0xff] }
  0x7d   :  { %1067 = vmatpush.bf16.msrb.mxu0 %v2796_v35 }
  0x7e   :  { %1080 = vmatpush.bf16.msrb.mxu1 %v2860_v54 }
  0x7f   :  { %1093 = vmatpush.bf16.msrb.mxu2 %v2924_v36 }
  0x80   :  { %1106 = vmatpush.bf16.msrb.mxu3 %v2988_v58 }
  0x81   :  { %1068 = vmatpush.bf16.msrb.mxu0 %v2788_v0 }
  0x82   :  { %1081 = vmatpush.bf16.msrb.mxu1 %v2852_v1 }
  0x83   :  { %1094 = vmatpush.bf16.msrb.mxu2 %v2916_v2 }
  0x84   :  { %1107 = vmatpush.bf16.msrb.mxu3 %v2980_v6 }
  0x85   :  { %1069 = vmatpush.bf16.msrb.mxu0 %v2780_v12  ;;  %v3794_v12 = vld [vmem:[%s4245_s3 + $0x68] sm:$0xff] }
  0x86   :  { %1082 = vmatpush.bf16.msrb.mxu1 %v2844_v13 }
  0x87   :  { %1095 = vmatpush.bf16.msrb.mxu2 %v2908_v14 }
  0x88   :  { %1108 = vmatpush.bf16.msrb.mxu3 %v2972_v18 }
  0x89   :  { %1070 = vmatpush.bf16.msrb.mxu0 %v2772_v24  ;;  %v3789_v24 = vld [vmem:[%s4245_s3 + $0x40] sm:$0xff] }
  0x8a   :  { %1083 = vmatpush.bf16.msrb.mxu1 %v2836_v25 }
  0x8b   :  { %1096 = vmatpush.bf16.msrb.mxu2 %v2900_v26  ;;  %v265_v26 = vperm.slane %v262_v50, 1  ;;  %v3135_v50 = vld [vmem:[#allocation4 + $0x70] sm:$0xf] }
  0x8c   :  { %1109 = vmatpush.bf16.msrb.mxu3 %v2964_v32 }
  0x8d   :  { %1071 = vmatpush.bf16.msrb.mxu0 %v2764_v41 }
  0x8e   :  { %1084 = vmatpush.bf16.msrb.mxu1 %v2828_v42 }
  0x8f   :  { %1097 = vmatpush.bf16.msrb.mxu2 %v2892_v45 }
  0x90   :  { %1110 = vmatpush.bf16.msrb.mxu3 %v2956_v46  ;;  %1072 = vmatmul.bf16.vlgmr.msrb.gmra.mxu0 %v4129_v43  ;;  %v3785_v43 = vld [vmem:[%s4245_s3 + $0x20] sm:$0xff] }
  0x91   :  { %1252 = vmatpush.bf16.msra.mxu0 %v3788_v47  ;;  %1085 = vmatmul.bf16.vlgmr.msrb.gmra.mxu1 %v4133_v48  ;;  %v3782_v48 = vld [vmem:[%s4245_s3 + $0x8] sm:$0xff] }
  0x92   :  { %1098 = vmatmul.bf16.vlgmr.msrb.gmra.mxu2 %v4127_v40  ;;  %v3784_v40 = vld [vmem:[%s4245_s3 + $0x18] sm:$0xff]  ;;  %1265 = vmatpush.bf16.msra.mxu1 %v3796_v5 }
  0x93   :  { %1111 = vmatmul.bf16.vlgmr.msrb.gmra.mxu3 %v4131_v44  ;;  %v3783_v44 = vld [vmem:[%s4245_s3 + $0x10] sm:$0xff] }
  0x95   :  { %1253 = vmatpush.bf16.msra.mxu0 %v3787_v30 }
  0x96   :  { %1266 = vmatpush.bf16.msra.mxu1 %v3795_v8  ;;  %v3804_v8 = vld [vmem:[#allocation4 + $0x34] sm:$0xf0] }
  0x99   :  { %1254 = vmatpush.bf16.msra.mxu0 %v3786_v49 }
  0x9a   :  { %1267 = vmatpush.bf16.msra.mxu1 %v3794_v12 }
  0x9d   :  { %1255 = vmatpush.bf16.msra.mxu0 %v3785_v43 }
  0x9e   :  { %1268 = vmatpush.bf16.msra.mxu1 %v3793_v15  ;;  %v3801_v15 = vld [vmem:[#allocation4 + $0x24] sm:$0xf] }
  0xa1   :  { %1256 = vmatpush.bf16.msra.mxu0 %v3784_v40 }
  0xa2   :  { %1269 = vmatpush.bf16.msra.mxu1 %v3792_v16  ;;  %v3097_v16 = vld [vmem:[#allocation4 + $0x28] sm:$0xf0] }
  0xa5   :  { %1257 = vmatpush.bf16.msra.mxu0 %v3783_v44 }
  0xa6   :  { %1270 = vmatpush.bf16.msra.mxu1 %v3791_v17 }
  0xa9   :  { %1258 = vmatpush.bf16.msra.mxu0 %v3782_v48 }
  0xaa   :  { %1271 = vmatpush.bf16.msra.mxu1 %v3790_v20 }
  0xad   :  { %1259 = vmatpush.bf16.msra.mxu0 %v3781_v51  ;;  %v3812_v51 = vld [vmem:[#allocation4 + $0x74] sm:$0xf0] }
  0xae   :  { %1272 = vmatpush.bf16.msra.mxu1 %v3789_v24 }
  0xb7   :  { %v917_v53 = vpop.f32.mrf.mxu0 }
  0xb8   :  { %v930_v31 = vpop.f32.mrf.mxu1  ;;  %v918_v35 = vadd.f32 %v917_v53, %v264_v52  ;;  %v3811_v52 = vld [vmem:[#allocation4 + $0x74] sm:$0xf]  ;;  %v3136_v53 = vor.u32 %v3812_v51, %v3135_v50  ;;  %v3591_v50 = vld [vmem:[#allocation6 + $0x380] sm:$0xf] }
  0xb9   :  { %v3929_v51 = vld [vmem:[#allocation6 + $0x39c] sm:$0xf0] }
  0xba   :  { %v931_v55 = vadd.f32 %v930_v31, %v918_v35  ;;  %v3137_v31 = vld [vmem:[#allocation4 + $0x78] sm:$0xf0]  ;;  %v3127_v35 = vld [vmem:[#allocation4 + $0x60] sm:$0xf]  ;;  %1382 = vmatpush.bf16.msra.mxu2 %v3136_v53  ;;  %v3592_v53 = vor.u32 %v3929_v51, %v3591_v50  ;;  %v3821_v50 = vld [vmem:[#allocation6 + $0x44] sm:$0xf] }
  0xbb   :  { %v943_v54 = vpop.f32.mrf.mxu2  ;;  %v3177_v51 = vld [vmem:[#allocation6 + $0x60] sm:$0xf0] }
  0xbc   :  { %v956_v36 = vpop.f32.mrf.mxu3  ;;  %v944_v58 = vadd.f32 %v943_v54, %v931_v55  ;;  %v3810_v54 = vld [vmem:[#allocation4 + $0x64] sm:$0xf0]  ;;  %v3809_v55 = vld [vmem:[#allocation4 + $0x64] sm:$0xf] }
  0xbe   :  { %v957_v61 = vadd.f32 %v956_v36, %v944_v58  ;;  %v3140_v36 = vor.u32 %v3811_v52, %v3137_v31  ;;  %v3861_v31 = vld [vmem:[#allocation6 + $0x184] sm:$0xf] }
  0xbf   :  { %v919_v56 = vpop.f32.mrf.mxu0 }
  0xc0   :  { %v932_v57 = vpop.f32.mrf.mxu1  ;;  %v3129_v56 = vld [vmem:[#allocation4 + $0x68] sm:$0xf0]  ;;  %1395 = vmatpush.bf16.msra.mxu3 %v3140_v36 }
  0xc1   :  { %v3128_v57 = vor.u32 %v3810_v54, %v3127_v35  ;;  %v3132_v58 = vor.u32 %v3809_v55, %v3129_v56  ;;  %v3337_v35 = vld [vmem:[#allocation6 + $0x1a0] sm:$0xf0]  ;;  %v3303_v56 = vld [vmem:[#allocation6 + $0x140] sm:$0xf] }
  0xc2   :  { %v3925_v54 = vld [vmem:[#allocation6 + $0x384] sm:$0xf]  ;;  %v3340_v36 = vor.u32 %v3861_v31, %v3337_v35 }
  0xc3   :  { %v945_v59 = vpop.f32.mrf.mxu2  ;;  %1383 = vmatpush.bf16.msra.mxu2 %v3128_v57  ;;  %v3593_v55 = vld [vmem:[#allocation6 + $0x3a0] sm:$0xf0]  ;;  %v3857_v57 = vld [vmem:[#allocation6 + $0x15c] sm:$0xf0] }
  0xc4   :  { %v958_v60 = vpop.f32.mrf.mxu3  ;;  %v3119_v59 = vld [vmem:[#allocation4 + $0x50] sm:$0xf]  ;;  %1396 = vmatpush.bf16.msra.mxu3 %v3132_v58  ;;  %v3596_v58 = vor.u32 %v3925_v54, %v3593_v55  ;;  %v3143_v54 = vld [vmem:[#allocation6] sm:$0xf] }
  0xc5   :  { %v3808_v60 = vld [vmem:[#allocation4 + $0x54] sm:$0xf0] }
  0xcd   :  { %v969_v62 = vpop.f32.mrf.mxu0 }
  0xce   :  { %v970_v63 = vadd.f32 %v969_v62, %v957_v61  ;;  %v982_v0 = vpop.f32.mrf.mxu1  ;;  %v3807_v61 = vld [vmem:[#allocation4 + $0x54] sm:$0xf]  ;;  %v3121_v62 = vld [vmem:[#allocation4 + $0x58] sm:$0xf0] }
  0xd0   :  { %v983_v1 = vadd.f32 %v982_v0, %v970_v63  ;;  %v3120_v63 = vor.u32 %v3808_v60, %v3119_v59  ;;  %v3124_v0 = vor.u32 %v3807_v61, %v3121_v62  ;;  %v3559_v59 = vld [vmem:[#allocation6 + $0x340] sm:$0xf]  ;;  %v3853_v61 = vld [vmem:[#allocation6 + $0x144] sm:$0xf]  ;;  %v3304_v62 = vor.u32 %v3857_v57, %v3303_v56 }
  0xd1   :  { %v3921_v60 = vld [vmem:[#allocation6 + $0x35c] sm:$0xf0]  ;;  %v3180_v57 = vor.u32 %v3821_v50, %v3177_v51  ;;  %v3535_v50 = vld [vmem:[#allocation6 + $0x308] sm:$0xf] }
  0xd2   :  { %1384 = vmatpush.bf16.msra.mxu2 %v3120_v63  ;;  %1397 = vmatpush.bf16.msra.mxu3 %v3124_v0  ;;  %v3305_v63 = vld [vmem:[#allocation6 + $0x160] sm:$0xf0]  ;;  %v3914_v51 = vld [vmem:[#allocation6 + $0x324] sm:$0xf0] }
  0xd3   :  { %v3917_v0 = vld [vmem:[#allocation6 + $0x344] sm:$0xf] }
  0xd5   :  { %v995_v2 = vpop.f32.mrf.mxu2  ;;  %v971_v7 = vpop.f32.mrf.mxu0 }
  0xd6   :  { %v996_v3 = vadd.f32 %v995_v2, %v983_v1  ;;  %v1008_v4 = vpop.f32.mrf.mxu3  ;;  %v984_v9 = vpop.f32.mrf.mxu1  ;;  %v3111_v1 = vld [vmem:[#allocation4 + $0x40] sm:$0xf]  ;;  %v3806_v2 = vld [vmem:[#allocation4 + $0x44] sm:$0xf0]  ;;  %v3103_v7 = vld [vmem:[#allocation4 + $0x30] sm:$0xf] }
  0xd7   :  { %v3112_v5 = vor.u32 %v3806_v2, %v3111_v1  ;;  %v3803_v9 = vld [vmem:[#allocation4 + $0x34] sm:$0xf]  ;;  %v3561_v1 = vld [vmem:[#allocation6 + $0x360] sm:$0xf0]  ;;  %v3560_v2 = vor.u32 %v3921_v60, %v3559_v59  ;;  %v3881_v59 = vld [vmem:[#allocation6 + $0x21c] sm:$0xf0] }
  0xd8   :  { %v1009_v6 = vadd.f32 %v1008_v4, %v996_v3  ;;  %v3805_v3 = vld [vmem:[#allocation4 + $0x44] sm:$0xf]  ;;  %v3113_v4 = vld [vmem:[#allocation4 + $0x48] sm:$0xf0] }
  0xd9   :  { %1385 = vmatpush.bf16.msra.mxu2 %v3112_v5  ;;  %v3849_v5 = vld [vmem:[#allocation6 + $0x11c] sm:$0xf0]  ;;  %v3813_v60 = vld [vmem:[#allocation6 + $0x4] sm:$0xf] }
  0xda   :  { %v1116_v10 = vmax.f32 %v1009_v6, 0.0  ;;  %v3116_v6 = vor.u32 %v3805_v3, %v3113_v4  ;;  %v3308_v3 = vor.u32 %v3853_v61, %v3305_v63  ;;  %v3271_v4 = vld [vmem:[#allocation6 + $0x100] sm:$0xf]  ;;  %v3145_v63 = vld [vmem:[#allocation6 + $0x20] sm:$0xf0] }
  0xdc   :  { %v1118_v11 = vpack.c.bf16 %v1116_v10, %v1116_v10  ;;  %v3105_v10 = vld [vmem:[#allocation4 + $0x38] sm:$0xf0]  ;;  %1398 = vmatpush.bf16.msra.mxu3 %v3116_v6  ;;  %v3527_v6 = vld [vmem:[#allocation6 + $0x300] sm:$0xf] }
  0xdd   :  { %v997_v13 = vpop.f32.mrf.mxu2  ;;  %v3108_v12 = vor.u32 %v3803_v9, %v3105_v10  ;;  %v3845_v9 = vld [vmem:[#allocation6 + $0x104] sm:$0xf] }
  0xde   :  { %1260 = vmatmul.bf16.vlgmr.msra.gmra.mxu0 %v1118_v11  ;;  %v1010_v14 = vpop.f32.mrf.mxu3  ;;  %v3104_v11 = vor.u32 %v3804_v8, %v3103_v7  ;;  %v3095_v13 = vld [vmem:[#allocation4 + $0x20] sm:$0xf]  ;;  %v3564_v7 = vor.u32 %v3917_v0, %v3561_v1  ;;  %v3273_v10 = vld [vmem:[#allocation6 + $0x120] sm:$0xf0] }
  0xdf   :  { %v3802_v14 = vld [vmem:[#allocation4 + $0x24] sm:$0xf0]  ;;  %v3913_v8 = vld [vmem:[#allocation6 + $0x31c] sm:$0xf0]  ;;  %v3877_v0 = vld [vmem:[#allocation6 + $0x204] sm:$0xf] }
  0xe0   :  { %1386 = vmatpush.bf16.msra.mxu2 %v3104_v11  ;;  %v3096_v17 = vor.u32 %v3802_v14, %v3095_v13  ;;  %1399 = vmatpush.bf16.msra.mxu3 %v3108_v12  ;;  %v3909_v11 = vld [vmem:[#allocation6 + $0x304] sm:$0xf]  ;;  %v3272_v13 = vor.u32 %v3849_v5, %v3271_v4  ;;  %v3528_v14 = vor.u32 %v3913_v8, %v3527_v6  ;;  %v3938_v5 = vld [vmem:[#allocation6 + $0x3e4] sm:$0xf0]  ;;  %v3870_v6 = vld [vmem:[#allocation6 + $0x1cc] sm:$0xf] }
  0xe1   :  { %v3529_v12 = vld [vmem:[#allocation6 + $0x320] sm:$0xf0] }
  0xe2   :  { %v3401_v1 = vld [vmem:[#allocation6 + $0x220] sm:$0xf0] }
  0xe4   :  { %1387 = vmatpush.bf16.msra.mxu2 %v3096_v17  ;;  %v3841_v17 = vld [vmem:[#allocation6 + $0xdc] sm:$0xf0] }
  0xed   :  { %v1021_v18 = vpop.f32.mrf.mxu0 }
  0xee   :  { %v1034_v19 = vpop.f32.mrf.mxu1  ;;  %v1022_v29 = vadd.f32 %v1021_v18, %v265_v26  ;;  %v3100_v18 = vor.u32 %v3801_v15, %v3097_v16  ;;  %v3276_v15 = vor.u32 %v3845_v9, %v3273_v10  ;;  %v3239_v16 = vld [vmem:[#allocation6 + $0xc0] sm:$0xf]  ;;  %v3377_v9 = vld [vmem:[#allocation6 + $0x1e8] sm:$0xf0] }
  0xef   :  { %v3934_v10 = vld [vmem:[#allocation6 + $0x3cc] sm:$0xf] }
  0xf0   :  { %v1035_v32 = vadd.f32 %v1034_v19, %v1022_v29  ;;  %1400 = vmatpush.bf16.msra.mxu3 %v3100_v18  ;;  %v3797_v29 = vld [vmem:[#allocation4 + $0x4] sm:$0xf]  ;;  %v3495_v18 = vld [vmem:[#allocation6 + $0x2c0] sm:$0xf] }
  0xf5   :  { %v1047_v21 = vpop.f32.mrf.mxu2  ;;  %v1023_v23 = vpop.f32.mrf.mxu0 }
  0xf6   :  { %v1060_v22 = vpop.f32.mrf.mxu3  ;;  %v1036_v25 = vpop.f32.mrf.mxu1  ;;  %v1048_v33 = vadd.f32 %v1047_v21, %v1035_v32  ;;  %v3087_v21 = vld [vmem:[#allocation4 + $0x10] sm:$0xf]  ;;  %v3799_v23 = vld [vmem:[#allocation4 + $0x14] sm:$0xf] }
  0xf7   :  { %v3089_v25 = vld [vmem:[#allocation4 + $0x18] sm:$0xf0] }
  0xf8   :  { %v1061_v34 = vadd.f32 %v1060_v22, %v1048_v33  ;;  %v3800_v22 = vld [vmem:[#allocation4 + $0x14] sm:$0xf0]  ;;  %v3092_v26 = vor.u32 %v3799_v23, %v3089_v25  ;;  %v3081_v33 = vld [vmem:[#allocation4 + $0x8] sm:$0xf0]  ;;  %v3241_v23 = vld [vmem:[#allocation6 + $0xe0] sm:$0xf0] }
  0xf9   :  { %v3088_v24 = vor.u32 %v3800_v22, %v3087_v21  ;;  %v3905_v21 = vld [vmem:[#allocation6 + $0x2dc] sm:$0xf0]  ;;  %v3837_v22 = vld [vmem:[#allocation6 + $0xc4] sm:$0xf] }
  0xfa   :  { %1401 = vmatpush.bf16.msra.mxu3 %v3092_v26  ;;  %v3497_v25 = vld [vmem:[#allocation6 + $0x2e0] sm:$0xf0]  ;;  %v3240_v26 = vor.u32 %v3841_v17, %v3239_v16  ;;  %v3343_v17 = vld [vmem:[#allocation6 + $0x188] sm:$0xf] }
  0xfb   :  { %1388 = vmatpush.bf16.msra.mxu2 %v3088_v24  ;;  %v3901_v24 = vld [vmem:[#allocation6 + $0x2c4] sm:$0xf] }
  0xfd   :  { %v1049_v27 = vpop.f32.mrf.mxu2 }
  0xfe   :  { %v1062_v28 = vpop.f32.mrf.mxu3  ;;  %v3079_v27 = vld [vmem:[#allocation4] sm:$0xf] }
  0xff   :  { %v3798_v28 = vld [vmem:[#allocation4 + $0x4] sm:$0xf0] }
 0x100   :  { %v3080_v32 = vor.u32 %v3798_v28, %v3079_v27  ;;  %v3496_v27 = vor.u32 %v3905_v21, %v3495_v18  ;;  %v3244_v28 = vor.u32 %v3837_v22, %v3241_v23  ;;  %v3866_v18 = vld [vmem:[#allocation6 + $0x1a4] sm:$0xf0] }
 0x101   :  { %v3599_v22 = vld [vmem:[#allocation6 + $0x388] sm:$0xf] }
 0x102   :  { %1389 = vmatpush.bf16.msra.mxu2 %v3080_v32  ;;  %v3833_v32 = vld [vmem:[#allocation6 + $0x9c] sm:$0xf0]  ;;  %v3930_v23 = vld [vmem:[#allocation6 + $0x3a4] sm:$0xf0] }
 0x10d   :  { %v1073_v37 = vpop.f32.mrf.mxu0 }
 0x10e   :  { %v1086_v38 = vpop.f32.mrf.mxu1  ;;  %v1074_v39 = vadd.f32 %v1073_v37, %v1061_v34  ;;  %v3084_v34 = vor.u32 %v3797_v29, %v3081_v33  ;;  %v3367_v37 = vld [vmem:[#allocation6 + $0x1c0] sm:$0xf] }
 0x10f   :  { %v3207_v29 = vld [vmem:[#allocation6 + $0x80] sm:$0xf] }
 0x110   :  { %v1087_v41 = vadd.f32 %v1086_v38, %v1074_v39  ;;  %1402 = vmatpush.bf16.msra.mxu3 %v3084_v34  ;;  %v3873_v38 = vld [vmem:[#allocation6 + $0x1dc] sm:$0xf0]  ;;  %v3500_v34 = vor.u32 %v3901_v24, %v3497_v25  ;;  %v3862_v24 = vld [vmem:[#allocation6 + $0x18c] sm:$0xf] }
 0x111   :  { %v3623_v39 = vld [vmem:[#allocation6 + $0x3c0] sm:$0xf] }
 0x112   :  { %v3463_v33 = vld [vmem:[#allocation6 + $0x280] sm:$0xf] }
 0x115   :  { %v1099_v42 = vpop.f32.mrf.mxu2  ;;  %v1075_v47 = vpop.f32.mrf.mxu0 }
 0x116   :  { %v1100_v45 = vadd.f32 %v1099_v42, %v1087_v41  ;;  %v1112_v46 = vpop.f32.mrf.mxu3  ;;  %v1088_v30 = vpop.f32.mrf.mxu1  ;;  %v3368_v41 = vor.u32 %v3873_v38, %v3367_v37  ;;  %v3937_v42 = vld [vmem:[#allocation6 + $0x3dc] sm:$0xf0]  ;;  %v3829_v38 = vld [vmem:[#allocation6 + $0x84] sm:$0xf] }
 0x117   :  { %v3624_v47 = vor.u32 %v3937_v42, %v3623_v39  ;;  %v3897_v37 = vld [vmem:[#allocation6 + $0x29c] sm:$0xf0]  ;;  %v3209_v39 = vld [vmem:[#allocation6 + $0xa0] sm:$0xf0] }
 0x118   :  { %v1113_v49 = vadd.f32 %v1112_v46, %v1100_v45  ;;  %v3869_v45 = vld [vmem:[#allocation6 + $0x1c4] sm:$0xf]  ;;  %2198 = vmatpush.bf16.msrb.mxu0 %v3368_v41 }
 0x119   :  { %v3369_v46 = vld [vmem:[#allocation6 + $0x1e0] sm:$0xf0]  ;;  %2211 = vmatpush.bf16.msrb.mxu1 %v3624_v47  ;;  %v3464_v47 = vor.u32 %v3897_v37, %v3463_v33  ;;  %v3311_v33 = vld [vmem:[#allocation6 + $0x148] sm:$0xf] }
 0x11a   :  { %v1117_v43 = vmax.f32 %v1113_v49, 0.0  ;;  %v3372_v30 = vor.u32 %v3869_v45, %v3369_v46  ;;  %v3933_v49 = vld [vmem:[#allocation6 + $0x3c4] sm:$0xf]  ;;  %v3948_v45 = vld [vmem:[%s4246_s4] ss:$0 sm:$0xff]  ;;  %v3208_v46 = vor.u32 %v3833_v32, %v3207_v29  ;;  %v3344_v29 = vor.u32 %v3866_v18, %v3343_v17 }
 0x11b   :  { %v3893_v41 = vld [vmem:[#allocation6 + $0x284] sm:$0xf]  ;;  %v3600_v32 = vor.u32 %v3930_v23, %v3599_v22  ;;  %v3826_v17 = vld [vmem:[#allocation6 + $0x64] sm:$0xf0]  ;;  %v3822_v22 = vld [vmem:[#allocation6 + $0x4c] sm:$0xf] }
 0x11c   :  { %v1119_v40 = vpack.c.bf16 %v1117_v43, %v1117_v43  ;;  %v3625_v43 = vld [vmem:[#allocation6 + $0x3e0] sm:$0xf0]  ;;  %2224 = vmatpush.bf16.msrb.mxu2 %v3372_v30  ;;  %v3212_v30 = vor.u32 %v3829_v38, %v3209_v39  ;;  %v3567_v39 = vld [vmem:[#allocation6 + $0x348] sm:$0xf] }
 0x11d   :  { %v1101_v44 = vpop.f32.mrf.mxu2  ;;  %2212 = vmatpush.bf16.msrb.mxu1 %v3592_v53  ;;  %v3465_v42 = vld [vmem:[#allocation6 + $0x2a0] sm:$0xf0] }
 0x11e   :  { %v1114_v48 = vpop.f32.mrf.mxu3  ;;  %1273 = vmatmul.bf16.vlgmr.msra.gmra.mxu1 %v1119_v40  ;;  %v3335_v40 = vld [vmem:[#allocation6 + $0x180] sm:$0xf]  ;;  %v3628_v44 = vor.u32 %v3933_v49, %v3625_v43  ;;  %v3433_v53 = vld [vmem:[#allocation6 + $0x260] sm:$0xf0] }
 0x11f   :  { %v3865_v48 = vld [vmem:[#allocation6 + $0x19c] sm:$0xf0] }
 0x120   :  { %v3336_v52 = vor.u32 %v3865_v48, %v3335_v40  ;;  %2237 = vmatpush.bf16.msrb.mxu3 %v3628_v44  ;;  %2225 = vmatpush.bf16.msrb.mxu2 %v3340_v36  ;;  %v3175_v49 = vld [vmem:[#allocation6 + $0x40] sm:$0xf]  ;;  %v3468_v44 = vor.u32 %v3893_v41, %v3465_v42  ;;  %v3922_v41 = vld [vmem:[#allocation6 + $0x364] sm:$0xf0]  ;;  %v3854_v42 = vld [vmem:[#allocation6 + $0x14c] sm:$0xf] }
 0x121   :  { %2213 = vmatpush.bf16.msrb.mxu1 %v3560_v2  ;;  %v3825_v43 = vld [vmem:[#allocation6 + $0x5c] sm:$0xf0]  ;;  %v3375_v2 = vld [vmem:[#allocation6 + $0x1c8] sm:$0xf] }
 0x122   :  { %2199 = vmatpush.bf16.msrb.mxu0 %v3336_v52  ;;  %v3431_v40 = vld [vmem:[#allocation6 + $0x240] sm:$0xf]  ;;  %v3885_v52 = vld [vmem:[#allocation6 + $0x244] sm:$0xf]  ;;  %v3176_v35 = vor.u32 %v3825_v43, %v3175_v49  ;;  %v3568_v49 = vor.u32 %v3922_v41, %v3567_v39  ;;  %v3279_v43 = vld [vmem:[#allocation6 + $0x108] sm:$0xf] }
 0x123   :  { %v3889_v48 = vld [vmem:[#allocation6 + $0x25c] sm:$0xf0]  ;;  %v3153_v39 = vld [vmem:[#allocation6 + $0x28] sm:$0xf0] }
 0x124   :  { %2238 = vmatpush.bf16.msrb.mxu3 %v3596_v58  ;;  %2226 = vmatpush.bf16.msrb.mxu2 %v3308_v3  ;;  %v3817_v36 = vld [vmem:[#allocation6 + $0x1c] sm:$0xf0]  ;;  %v3432_v56 = vor.u32 %v3889_v48, %v3431_v40  ;;  %v3631_v3 = vld [vmem:[#allocation6 + $0x3c8] sm:$0xf] }
 0x125   :  { %2214 = vmatpush.bf16.msrb.mxu1 %v3528_v14  ;;  %v3399_v58 = vld [vmem:[#allocation6 + $0x200] sm:$0xf]  ;;  %v3404_v14 = vor.u32 %v3877_v0, %v3401_v1  ;;  %v3632_v16 = vor.u32 %v3938_v5, %v3631_v3  ;;  %v3850_v40 = vld [vmem:[#allocation6 + $0x124] sm:$0xf0]  ;;  %v3505_v0 = vld [vmem:[#allocation6 + $0x2e8] sm:$0xf0] }
 0x126   :  { %2200 = vmatpush.bf16.msrb.mxu0 %v3304_v62  ;;  %v3436_v62 = vor.u32 %v3885_v52, %v3433_v53  ;;  %v3400_v8 = vor.u32 %v3881_v59, %v3399_v58  ;;  %v3846_v52 = vld [vmem:[#allocation6 + $0x10c] sm:$0xf]  ;;  %v3503_v59 = vld [vmem:[#allocation6 + $0x2c8] sm:$0xf] }
 0x127   :  { %v3281_v53 = vld [vmem:[#allocation6 + $0x128] sm:$0xf0]  ;;  %v3834_v3 = vld [vmem:[#allocation6 + $0xa4] sm:$0xf0] }
 0x128   :  { %2239 = vmatpush.bf16.msrb.mxu3 %v3564_v7  ;;  %2227 = vmatpush.bf16.msrb.mxu2 %v3276_v15  ;;  %v3144_v7 = vor.u32 %v3817_v36, %v3143_v54  ;;  %v3280_v54 = vor.u32 %v3850_v40, %v3279_v43  ;;  %v3536_v36 = vor.u32 %v3914_v51, %v3535_v50  ;;  %v3383_v51 = vld [vmem:[#allocation6 + $0x1d0] sm:$0xf] }
 0x129   :  { %2215 = vmatpush.bf16.msrb.mxu1 %v3496_v27  ;;  %v3926_v27 = vld [vmem:[#allocation6 + $0x38c] sm:$0xf] }
 0x12a   :  { %2201 = vmatpush.bf16.msrb.mxu0 %v3272_v13  ;;  %v3148_v13 = vor.u32 %v3813_v60, %v3145_v63  ;;  %v3906_v60 = vld [vmem:[#allocation6 + $0x2e4] sm:$0xf0]  ;;  %v3902_v63 = vld [vmem:[#allocation6 + $0x2cc] sm:$0xf] }
 0x12b   :  { %v3508_v5 = vor.u32 %v3902_v63, %v3505_v0  ;;  %v3867_v63 = vld [vmem:[#allocation6 + $0x1ac] sm:$0xf0] }
 0x12c   :  { %2228 = vmatpush.bf16.msrb.mxu2 %v3244_v28  ;;  %v3601_v28 = vld [vmem:[#allocation6 + $0x3a8] sm:$0xf0] }
 0x12d   :  { %2216 = vmatpush.bf16.msrb.mxu1 %v3464_v47  ;;  %v3604_v38 = vor.u32 %v3926_v27, %v3601_v28  ;;  %v3569_v47 = vld [vmem:[#allocation6 + $0x368] sm:$0xf0] }
 0x12e   :  { %2202 = vmatpush.bf16.msrb.mxu0 %v3240_v26  ;;  %v3345_v26 = vld [vmem:[#allocation6 + $0x1a8] sm:$0xf0] }
 0x12f   :  { %v3348_v37 = vor.u32 %v3862_v24, %v3345_v26  ;;  %v3185_v24 = vld [vmem:[#allocation6 + $0x68] sm:$0xf0] }
 0x130   :  { %2229 = vmatpush.bf16.msrb.mxu2 %v3212_v30  ;;  %v3441_v26 = vld [vmem:[#allocation6 + $0x268] sm:$0xf0]  ;;  %v3188_v27 = vor.u32 %v3822_v22, %v3185_v24  ;;  %v3287_v24 = vld [vmem:[#allocation6 + $0x110] sm:$0xf] }
 0x131   :  { %2217 = vmatpush.bf16.msrb.mxu1 %v3432_v56  ;;  %v3842_v56 = vld [vmem:[#allocation6 + $0xe4] sm:$0xf0] }
 0x132   :  { %2203 = vmatpush.bf16.msrb.mxu0 %v3208_v46  ;;  %v3918_v46 = vld [vmem:[#allocation6 + $0x34c] sm:$0xf] }
 0x133   :  { %v3572_v48 = vor.u32 %v3918_v46, %v3569_v47  ;;  %v3409_v46 = vld [vmem:[#allocation6 + $0x228] sm:$0xf0] }
 0x134   :  { %2230 = vmatpush.bf16.msrb.mxu2 %v3180_v57  ;;  %v3284_v57 = vor.u32 %v3846_v52, %v3281_v53  ;;  %v3875_v52 = vld [vmem:[#allocation6 + $0x1ec] sm:$0xf0] }
 0x135   :  { %2218 = vmatpush.bf16.msrb.mxu1 %v3400_v8  ;;  %v3830_v8 = vld [vmem:[#allocation6 + $0x8c] sm:$0xf]  ;;  %v3639_v53 = vld [vmem:[#allocation6 + $0x3d0] sm:$0xf] }
 0x136   :  { %2204 = vmatpush.bf16.msrb.mxu0 %v3176_v35  ;;  %v3537_v35 = vld [vmem:[#allocation6 + $0x328] sm:$0xf0] }
 0x138   :  { %2231 = vmatpush.bf16.msrb.mxu2 %v3148_v13 }
 0x139   :  { %2263 = vmatpush.bf16.msra.mxu1 %v3632_v16  ;;  %v3183_v16 = vld [vmem:[#allocation6 + $0x48] sm:$0xf] }
 0x13a   :  { %2205 = vmatpush.bf16.msrb.mxu0 %v3144_v7  ;;  %v3898_v7 = vld [vmem:[#allocation6 + $0x2a4] sm:$0xf0]  ;;  %v3184_v18 = vor.u32 %v3826_v17, %v3183_v16  ;;  %v3923_v16 = vld [vmem:[#allocation6 + $0x36c] sm:$0xf0]  ;;  %v3855_v17 = vld [vmem:[#allocation6 + $0x154] sm:$0xf] }
 0x13d   :  { %2264 = vmatpush.bf16.msra.mxu1 %v3600_v32  ;;  %v3818_v32 = vld [vmem:[#allocation6 + $0x24] sm:$0xf0] }
 0x141   :  { %2265 = vmatpush.bf16.msra.mxu1 %v3568_v49 }
 0x145   :  { %2266 = vmatpush.bf16.msra.mxu1 %v3536_v36 }
 0x15b   :  { %v4198_v19 = vpop.f32.mrf.mxu0 }
 0x15c   :  { %v1262_v31 = vadd.f32 %v3948_v45, %v4198_v19  ;;  %v3874_v19 = vld [vmem:[#allocation6 + $0x1e4] sm:$0xf0]  ;;  %v3313_v45 = vld [vmem:[#allocation6 + $0x168] sm:$0xf0] }
 0x15d   :  { %v3376_v15 = vor.u32 %v3874_v19, %v3375_v2  ;;  %v3504_v2 = vor.u32 %v3906_v60, %v3503_v59  ;;  %v3215_v19 = vld [vmem:[#allocation6 + $0x88] sm:$0xf]  ;;  %v3384_v60 = vor.u32 %v3875_v52, %v3383_v51  ;;  %v3223_v51 = vld [vmem:[#allocation6 + $0x90] sm:$0xf] }
 0x15e   :  { %v3835_v52 = vld [vmem:[#allocation6 + $0xac] sm:$0xf0] }
 0x15f   :  { %2250 = vmatpush.bf16.msra.mxu0 %v3376_v15  ;;  %2267 = vmatpush.bf16.msra.mxu1 %v3504_v2  ;;  %v3607_v2 = vld [vmem:[#allocation6 + $0x390] sm:$0xf] }
 0x163   :  { %v1263_v20 = vpop.f32.mrf.mxu0  ;;  %2251 = vmatpush.bf16.msra.mxu0 %v3344_v29  ;;  %v3151_v29 = vld [vmem:[#allocation6 + $0x8] sm:$0xf] }
 0x164   :  { %v3532_v20 = vor.u32 %v3909_v11, %v3529_v12  ;;  %v3633_v11 = vld [vmem:[#allocation6 + $0x3e8] sm:$0xf0] }
 0x165   :  { %v3636_v21 = vor.u32 %v3934_v10, %v3633_v11  ;;  %v3894_v10 = vld [vmem:[#allocation6 + $0x28c] sm:$0xf] }
 0x166   :  { %2240 = vmatpush.bf16.msrb.mxu3 %v3532_v20  ;;  %v3380_v20 = vor.u32 %v3870_v6, %v3377_v9  ;;  %v3471_v6 = vld [vmem:[#allocation6 + $0x288] sm:$0xf]  ;;  %v3217_v9 = vld [vmem:[#allocation6 + $0xa8] sm:$0xf0] }
 0x167   :  { %v3473_v11 = vld [vmem:[#allocation6 + $0x2a8] sm:$0xf0]  ;;  %v3472_v13 = vor.u32 %v3898_v7, %v3471_v6  ;;  %v3609_v6 = vld [vmem:[#allocation6 + $0x3b0] sm:$0xf0] }
 0x168   :  { %v3476_v15 = vor.u32 %v3894_v10, %v3473_v11  ;;  %v3319_v11 = vld [vmem:[#allocation6 + $0x150] sm:$0xf] }
 0x169   :  { %2268 = vmatpush.bf16.msra.mxu1 %v3472_v13 }
 0x16a   :  { %2241 = vmatpush.bf16.msrb.mxu3 %v3500_v34  ;;  %v3858_v34 = vld [vmem:[#allocation6 + $0x164] sm:$0xf0] }
 0x16b   :  { %v3312_v30 = vor.u32 %v3858_v34, %v3311_v33  ;;  %v3407_v33 = vld [vmem:[#allocation6 + $0x208] sm:$0xf]  ;;  %v3152_v34 = vor.u32 %v3818_v32, %v3151_v29  ;;  %v3915_v29 = vld [vmem:[#allocation6 + $0x32c] sm:$0xf0]  ;;  %v3847_v32 = vld [vmem:[#allocation6 + $0x114] sm:$0xf] }
 0x16d   :  { %2252 = vmatpush.bf16.msra.mxu0 %v3312_v30  ;;  %v1296_v30 = vld [vmem:[%s4248_s6] sm:$0x3] }
 0x16e   :  { %2242 = vmatpush.bf16.msrb.mxu3 %v3468_v44  ;;  %v3316_v44 = vor.u32 %v3854_v42, %v3313_v45  ;;  %v3878_v45 = vld [vmem:[#allocation6 + $0x20c] sm:$0xf]  ;;  %v1298_v49 = vperm.slane %v1296_v30, 0  ;;  %v1299_v43 = vperm.slane %v1296_v30, 1  ;;  %v3907_v30 = vld [vmem:[#allocation6 + $0x2ec] sm:$0xf0] }
 0x16f   :  { %v3412_v47 = vor.u32 %v3878_v45, %v3409_v46 }
 0x171   :  { %2253 = vmatpush.bf16.msra.mxu0 %v3280_v54  ;;  %v3385_v54 = vld [vmem:[#allocation6 + $0x1f0] sm:$0xf0] }
 0x172   :  { %2243 = vmatpush.bf16.msrb.mxu3 %v3436_v62  ;;  %v3249_v62 = vld [vmem:[#allocation6 + $0xe8] sm:$0xf0] }
 0x176   :  { %2244 = vmatpush.bf16.msrb.mxu3 %v3404_v14  ;;  %v3220_v14 = vor.u32 %v3830_v8, %v3217_v9 }
 0x19b   :  { %v1274_v55 = vpop.f32.mrf.mxu1 }
 0x19c   :  { %v1275_v61 = vadd.f32 %v1274_v55, %v1262_v31  ;;  %v3910_v31 = vld [vmem:[#allocation6 + $0x30c] sm:$0xf]  ;;  %v3247_v55 = vld [vmem:[#allocation6 + $0xc8] sm:$0xf] }
 0x19d   :  { %v3540_v58 = vor.u32 %v3910_v31, %v3537_v35  ;;  %v3248_v1 = vor.u32 %v3842_v56, %v3247_v55  ;;  %v3939_v31 = vld [vmem:[#allocation6 + $0x3ec] sm:$0xf0]  ;;  %v3871_v35 = vld [vmem:[#allocation6 + $0x1d4] sm:$0xf] }
 0x19e   :  { %v1278_v4 = vmax.f32 %v1275_v61, 0.0  ;;  %v3838_v61 = vld [vmem:[#allocation6 + $0xcc] sm:$0xf]  ;;  %v3935_v56 = vld [vmem:[#allocation6 + $0x3d4] sm:$0xf]  ;;  %v3388_v0 = vor.u32 %v3871_v35, %v3385_v54 }
 0x19f   :  { %2254 = vmatpush.bf16.msra.mxu0 %v3248_v1  ;;  %v3479_v35 = vld [vmem:[#allocation6 + $0x290] sm:$0xf] }
 0x1a0   :  { %v1279_v12 = vpack.c.bf16 %v1278_v4, %v1278_v4  ;;  %v3252_v4 = vor.u32 %v3838_v61, %v3249_v62  ;;  %v3640_v61 = vor.u32 %v3939_v31, %v3639_v53  ;;  %v3351_v62 = vld [vmem:[#allocation6 + $0x190] sm:$0xf] }
 0x1a1   :  { %v3352_v9 = vor.u32 %v3867_v63, %v3351_v62  ;;  %v3899_v54 = vld [vmem:[#allocation6 + $0x2ac] sm:$0xf0] }
 0x1a2   :  { %1390 = vmatmul.bf16.vlgmr.msra.gmra.mxu2 %v1279_v12  ;;  %1403 = vmatmul.bf16.vlgmr.msra.gmra.mxu3 %v1279_v12  ;;  %v3216_v12 = vor.u32 %v3834_v3, %v3215_v19  ;;  %v3931_v19 = vld [vmem:[#allocation6 + $0x3ac] sm:$0xf0]  ;;  %v3863_v3 = vld [vmem:[#allocation6 + $0x194] sm:$0xf] }
 0x1a3   :  { %v1276_v25 = vpop.f32.mrf.mxu1  ;;  %2276 = vmatpush.bf16.msra.mxu2 %v3380_v20  ;;  %2289 = vmatpush.bf16.msra.mxu3 %v3636_v21  ;;  %v3439_v20 = vld [vmem:[#allocation6 + $0x248] sm:$0xf]  ;;  %v3608_v10 = vor.u32 %v3931_v19, %v3607_v2  ;;  %v3191_v62 = vld [vmem:[#allocation6 + $0x50] sm:$0xf] }
 0x1a4   :  { %2255 = vmatpush.bf16.msra.mxu0 %v3216_v12  ;;  %v3890_v21 = vld [vmem:[#allocation6 + $0x264] sm:$0xf0]  ;;  %v3886_v25 = vld [vmem:[#allocation6 + $0x24c] sm:$0xf]  ;;  %v3859_v12 = vld [vmem:[#allocation6 + $0x16c] sm:$0xf0] }
 0x1a5   :  { %v3440_v23 = vor.u32 %v3890_v21, %v3439_v20  ;;  %v3444_v28 = vor.u32 %v3886_v25, %v3441_v26  ;;  %v3919_v20 = vld [vmem:[#allocation6 + $0x354] sm:$0xf]  ;;  %v3320_v22 = vor.u32 %v3859_v12, %v3319_v11  ;;  %v3851_v25 = vld [vmem:[#allocation6 + $0x12c] sm:$0xf0] }
 0x1a6   :  { %v3577_v21 = vld [vmem:[#allocation6 + $0x370] sm:$0xf0]  ;;  %v3827_v63 = vld [vmem:[#allocation6 + $0x6c] sm:$0xf0] }
 0x1a7   :  { %2277 = vmatpush.bf16.msra.mxu2 %v3348_v37  ;;  %2290 = vmatpush.bf16.msra.mxu3 %v3604_v38  ;;  %v3882_v37 = vld [vmem:[#allocation6 + $0x224] sm:$0xf0]  ;;  %v3814_v38 = vld [vmem:[#allocation6 + $0xc] sm:$0xf]  ;;  %v3447_v2 = vld [vmem:[#allocation6 + $0x250] sm:$0xf] }
 0x1a8   :  { %2256 = vmatpush.bf16.msra.mxu0 %v3184_v18  ;;  %2269 = vmatpush.bf16.msra.mxu1 %v3440_v23  ;;  %v3408_v41 = vor.u32 %v3882_v37, %v3407_v33  ;;  %v3156_v42 = vor.u32 %v3814_v38, %v3153_v39  ;;  %v3321_v18 = vld [vmem:[#allocation6 + $0x170] sm:$0xf0]  ;;  %v3288_v38 = vor.u32 %v3851_v25, %v3287_v24  ;;  %v3891_v19 = vld [vmem:[#allocation6 + $0x26c] sm:$0xf0]  ;;  %v3872_v24 = vld [vmem:[#allocation6 + $0x1dc] sm:$0xf] }
 0x1a9   :  { %v3324_v26 = vor.u32 %v3855_v17, %v3321_v18  ;;  %v3289_v33 = vld [vmem:[#allocation6 + $0x130] sm:$0xf0]  ;;  %v3415_v11 = vld [vmem:[#allocation6 + $0x210] sm:$0xf] }
 0x1aa   :  { %v3545_v37 = vld [vmem:[#allocation6 + $0x330] sm:$0xf0]  ;;  %v3292_v45 = vor.u32 %v3847_v32, %v3289_v33  ;;  %v3883_v12 = vld [vmem:[#allocation6 + $0x22c] sm:$0xf0] }
 0x1ab   :  { %2278 = vmatpush.bf16.msra.mxu2 %v3316_v44  ;;  %2291 = vmatpush.bf16.msra.mxu3 %v3572_v48  ;;  %v3879_v17 = vld [vmem:[#allocation6 + $0x214] sm:$0xf] }
 0x1ac   :  { %2257 = vmatpush.bf16.msra.mxu0 %v3152_v34  ;;  %2270 = vmatpush.bf16.msra.mxu1 %v3408_v41  ;;  %v3911_v34 = vld [vmem:[#allocation6 + $0x314] sm:$0xf]  ;;  %v3255_v41 = vld [vmem:[#allocation6 + $0xd0] sm:$0xf] }
 0x1ad   :  { %v3548_v46 = vor.u32 %v3911_v34, %v3545_v37  ;;  %v3417_v18 = vld [vmem:[#allocation6 + $0x230] sm:$0xf0] }
 0x1ae   :  { %v3420_v33 = vor.u32 %v3879_v17, %v3417_v18 }
 0x1af   :  { %2279 = vmatpush.bf16.msra.mxu2 %v3284_v57  ;;  %2292 = vmatpush.bf16.msra.mxu3 %v3540_v58  ;;  %v3641_v57 = vld [vmem:[#allocation6 + $0x3f0] sm:$0xf0] }
 0x1b0   :  { %v3644_v1 = vor.u32 %v3935_v56, %v3641_v57  ;;  %v3895_v56 = vld [vmem:[#allocation6 + $0x294] sm:$0xf] }
 0x1b1   :  { %v3481_v57 = vld [vmem:[#allocation6 + $0x2b0] sm:$0xf0] }
 0x1b3   :  { %2280 = vmatpush.bf16.msra.mxu2 %v3252_v4  ;;  %2293 = vmatpush.bf16.msra.mxu3 %v3508_v5  ;;  %v3353_v4 = vld [vmem:[#allocation6 + $0x1b0] sm:$0xf0] }
 0x1b4   :  { %v3927_v5 = vld [vmem:[#allocation6 + $0x394] sm:$0xf]  ;;  %v3356_v13 = vor.u32 %v3863_v3, %v3353_v4 }
 0x1b5   :  { %v3823_v3 = vld [vmem:[#allocation6 + $0x54] sm:$0xf] }
 0x1b6   :  { %v3193_v4 = vld [vmem:[#allocation6 + $0x70] sm:$0xf0] }
 0x1b7   :  { %2281 = vmatpush.bf16.msra.mxu2 %v3220_v14  ;;  %2294 = vmatpush.bf16.msra.mxu3 %v3476_v15  ;;  %v3612_v14 = vor.u32 %v3927_v5, %v3609_v6  ;;  %v3575_v15 = vld [vmem:[#allocation6 + $0x350] sm:$0xf]  ;;  %v3887_v5 = vld [vmem:[#allocation6 + $0x254] sm:$0xf] }
 0x1b8   :  { %v3576_v23 = vor.u32 %v3923_v16, %v3575_v15  ;;  %v3449_v6 = vld [vmem:[#allocation6 + $0x270] sm:$0xf0] }
 0x1b9   :  { %v3815_v15 = vld [vmem:[#allocation6 + $0x14] sm:$0xf] }
 0x1ba   :  { %v3161_v16 = vld [vmem:[#allocation6 + $0x30] sm:$0xf0] }
 0x1bb   :  { %2282 = vmatpush.bf16.msra.mxu2 %v3188_v27  ;;  %2295 = vmatpush.bf16.msra.mxu3 %v3444_v28  ;;  %v3580_v27 = vor.u32 %v3919_v20, %v3577_v21  ;;  %v3543_v28 = vld [vmem:[#allocation6 + $0x310] sm:$0xf]  ;;  %v3391_v20 = vld [vmem:[#allocation6 + $0x1d8] sm:$0xf]  ;;  %v3164_v32 = vor.u32 %v3815_v15, %v3161_v16  ;;  %v3904_v15 = vld [vmem:[#allocation6 + $0x2dc] sm:$0xf] }
 0x1bc   :  { %v3544_v39 = vor.u32 %v3915_v29, %v3543_v28  ;;  %v3876_v21 = vld [vmem:[#allocation6 + $0x1f4] sm:$0xf0]  ;;  %v3936_v28 = vld [vmem:[#allocation6 + $0x3dc] sm:$0xf] }
 0x1bd   :  { %v3649_v29 = vld [vmem:[#allocation6 + $0x3f8] sm:$0xf0]  ;;  %v3392_v34 = vor.u32 %v3876_v21, %v3391_v20  ;;  %v3231_v20 = vld [vmem:[#allocation6 + $0x98] sm:$0xf] }
 0x1be   :  { %v3521_v16 = vld [vmem:[#allocation6 + $0x2f8] sm:$0xf0]  ;;  %v3836_v21 = vld [vmem:[#allocation6 + $0xb4] sm:$0xf0] }
 0x1bf   :  { %2283 = vmatpush.bf16.msra.mxu2 %v3156_v42  ;;  %2296 = vmatpush.bf16.msra.mxu3 %v3412_v47  ;;  %v3843_v42 = vld [vmem:[#allocation6 + $0xec] sm:$0xf0] }
 0x1c0   :  { %v3511_v47 = vld [vmem:[#allocation6 + $0x2d0] sm:$0xf] }
 0x225   :  { %v1391_v40 = vpop.f32.mrf.mxu2  ;;  %v1404_v44 = vpop.f32.mrf.mxu3 }
 0x226   :  { %v1392_v48 = vadd.f32 %v1391_v40, %v1298_v49  ;;  %v1405_v50 = vadd.f32 %v1404_v44, %v1299_v43  ;;  %v3839_v49 = vld [vmem:[#allocation6 + $0xd4] sm:$0xf] }
 0x227   :  { %v3257_v43 = vld [vmem:[#allocation6 + $0xf0] sm:$0xf0] }
 0x228   :  { %v1408_v36 = vmax.f32 %v1392_v48, 0.0  ;;  %v1409_v55 = vmax.f32 %v1405_v50, 0.0  ;;  %v3903_v40 = vld [vmem:[#allocation6 + $0x2d4] sm:$0xf]  ;;  %v3256_v48 = vor.u32 %v3843_v42, %v3255_v41  ;;  %v3512_v50 = vor.u32 %v3907_v30, %v3511_v47  ;;  %v3864_v47 = vld [vmem:[#allocation6 + $0x19c] sm:$0xf] }
 0x229   :  { %v3513_v44 = vld [vmem:[#allocation6 + $0x2f0] sm:$0xf0]  ;;  %v3260_v53 = vor.u32 %v3839_v49, %v3257_v43  ;;  %v3652_v42 = vor.u32 %v3936_v28, %v3649_v29  ;;  %v3361_v30 = vld [vmem:[#allocation6 + $0x1b8] sm:$0xf0] }
 0x22a   :  { %v4207_v58 = vpack.c.bf16 %v1408_v36, %v1408_v36  ;;  %v4209_v59 = vpack.c.bf16 %v1409_v55, %v1409_v55  ;;  %v3516_v31 = vor.u32 %v3903_v40, %v3513_v44  ;;  %v3831_v36 = vld [vmem:[#allocation6 + $0x94] sm:$0xf]  ;;  %v3928_v49 = vld [vmem:[#allocation6 + $0x39c] sm:$0xf] }
 0x22b   :  { %v3225_v55 = vld [vmem:[#allocation6 + $0xb0] sm:$0xf0]  ;;  %v3617_v43 = vld [vmem:[#allocation6 + $0x3b8] sm:$0xf0] }
 0x22c   :  { %2206 = vmatmul.bf16.vlgmr.msrb.gmra.mxu0 %v4207_v58  ;;  %2219 = vmatmul.bf16.vlgmr.msrb.gmra.mxu1 %v4209_v59  ;;  %v3896_v28 = vld [vmem:[#allocation6 + $0x29c] sm:$0xf] }
 0x22d   :  { %2232 = vmatmul.bf16.vlgmr.msrb.gmra.mxu2 %v4207_v58  ;;  %2245 = vmatmul.bf16.vlgmr.msrb.gmra.mxu3 %v4209_v59  ;;  %v1393_v7 = vpop.f32.mrf.mxu2  ;;  %v1406_v8 = vpop.f32.mrf.mxu3  ;;  %v3489_v29 = vld [vmem:[#allocation6 + $0x2b8] sm:$0xf0] }
 0x22e   :  { %2302 = vmatpush.bf16.msrb.mxu0 %v3384_v60  ;;  %2315 = vmatpush.bf16.msrb.mxu1 %v3640_v61  ;;  %v3224_v60 = vor.u32 %v3835_v52, %v3223_v51  ;;  %v3480_v61 = vor.u32 %v3899_v54, %v3479_v35  ;;  %v3159_v7 = vld [vmem:[#allocation6 + $0x10] sm:$0xf]  ;;  %v3192_v8 = vor.u32 %v3827_v63, %v3191_v62  ;;  %v3856_v35 = vld [vmem:[#allocation6 + $0x15c] sm:$0xf] }
 0x22f   :  { %2328 = vmatpush.bf16.msrb.mxu2 %v3388_v0  ;;  %2341 = vmatpush.bf16.msrb.mxu3 %v3644_v1  ;;  %v3228_v0 = vor.u32 %v3831_v36, %v3225_v55  ;;  %v3484_v1 = vor.u32 %v3895_v56, %v3481_v57  ;;  %v3364_v51 = vor.u32 %v3864_v47, %v3361_v30  ;;  %v3329_v54 = vld [vmem:[#allocation6 + $0x178] sm:$0xf0] }
 0x230   :  { %v3620_v52 = vor.u32 %v3928_v49, %v3617_v43  ;;  %v3920_v36 = vld [vmem:[#allocation6 + $0x35c] sm:$0xf]  ;;  %v3332_v62 = vor.u32 %v3856_v35, %v3329_v54 }
 0x231   :  { %v3585_v55 = vld [vmem:[#allocation6 + $0x378] sm:$0xf0] }
 0x232   :  { %2303 = vmatpush.bf16.msrb.mxu0 %v3352_v9  ;;  %2316 = vmatpush.bf16.msrb.mxu1 %v3608_v10  ;;  %v3448_v9 = vor.u32 %v3891_v19, %v3447_v2  ;;  %v3819_v10 = vld [vmem:[#allocation6 + $0x2c] sm:$0xf0]  ;;  %v3588_v63 = vor.u32 %v3920_v36, %v3585_v55  ;;  %v3848_v2 = vld [vmem:[#allocation6 + $0x11c] sm:$0xf] }
 0x233   :  { %2329 = vmatpush.bf16.msrb.mxu2 %v3356_v13  ;;  %2342 = vmatpush.bf16.msrb.mxu3 %v3612_v14  ;;  %v3196_v13 = vor.u32 %v3823_v3, %v3193_v4  ;;  %v3452_v14 = vor.u32 %v3887_v5, %v3449_v6  ;;  %v3160_v25 = vor.u32 %v3819_v10, %v3159_v7  ;;  %v3297_v19 = vld [vmem:[#allocation6 + $0x138] sm:$0xf0]  ;;  %v3263_v7 = vld [vmem:[#allocation6 + $0xd8] sm:$0xf] }
 0x234   :  { %v3912_v3 = vld [vmem:[#allocation6 + $0x31c] sm:$0xf] }
 0x235   :  { %v3553_v4 = vld [vmem:[#allocation6 + $0x338] sm:$0xf0] }
 0x236   :  { %2304 = vmatpush.bf16.msrb.mxu0 %v3320_v22  ;;  %2317 = vmatpush.bf16.msrb.mxu1 %v3576_v23  ;;  %v3647_v22 = vld [vmem:[#allocation6 + $0x3d8] sm:$0xf]  ;;  %v3556_v10 = vor.u32 %v3912_v3, %v3553_v4  ;;  %v3888_v47 = vld [vmem:[#allocation6 + $0x25c] sm:$0xf] }
 0x237   :  { %2330 = vmatpush.bf16.msrb.mxu2 %v3324_v26  ;;  %2343 = vmatpush.bf16.msrb.mxu3 %v3580_v27  ;;  %v3940_v23 = vld [vmem:[#allocation6 + $0x3f4] sm:$0xf0]  ;;  %v3416_v26 = vor.u32 %v3883_v12, %v3415_v11  ;;  %v3393_v27 = vld [vmem:[#allocation6 + $0x1f8] sm:$0xf0] }
 0x238   :  { %v3648_v37 = vor.u32 %v3940_v23, %v3647_v22  ;;  %v3396_v41 = vor.u32 %v3872_v24, %v3393_v27  ;;  %v3519_v11 = vld [vmem:[#allocation6 + $0x2d8] sm:$0xf]  ;;  %v3524_v23 = vor.u32 %v3904_v15, %v3521_v16  ;;  %v3233_v27 = vld [vmem:[#allocation6 + $0xb8] sm:$0xf0] }
 0x239   :  { %v3908_v12 = vld [vmem:[#allocation6 + $0x2f4] sm:$0xf0]  ;;  %v3457_v30 = vld [vmem:[#allocation6 + $0x278] sm:$0xf0] }
 0x23a   :  { %2305 = vmatpush.bf16.msrb.mxu0 %v3288_v38  ;;  %2318 = vmatpush.bf16.msrb.mxu1 %v3544_v39  ;;  %v3359_v38 = vld [vmem:[#allocation6 + $0x198] sm:$0xf]  ;;  %v3520_v18 = vor.u32 %v3908_v12, %v3519_v11  ;;  %v3880_v35 = vld [vmem:[#allocation6 + $0x21c] sm:$0xf] }
 0x23b   :  { %2331 = vmatpush.bf16.msrb.mxu2 %v3292_v45  ;;  %2344 = vmatpush.bf16.msrb.mxu3 %v3548_v46  ;;  %v3868_v39 = vld [vmem:[#allocation6 + $0x1b4] sm:$0xf0]  ;;  %v3425_v54 = vld [vmem:[#allocation6 + $0x238] sm:$0xf0] }
 0x23c   :  { %2258 = vmatmul.bf16.vlgmr.msra.gmra.mxu0 %v4207_v58  ;;  %2271 = vmatmul.bf16.vlgmr.msra.gmra.mxu1 %v4209_v59  ;;  %v3615_v45 = vld [vmem:[#allocation6 + $0x398] sm:$0xf]  ;;  %v3360_v40 = vor.u32 %v3868_v39, %v3359_v38  ;;  %v3492_v39 = vor.u32 %v3896_v28, %v3489_v29 }
 0x23d   :  { %2284 = vmatmul.bf16.vlgmr.msra.gmra.mxu2 %v4207_v58  ;;  %2297 = vmatmul.bf16.vlgmr.msra.gmra.mxu3 %v4209_v59  ;;  %v3932_v46 = vld [vmem:[#allocation6 + $0x3b4] sm:$0xf0] }
 0x23e   :  { %2306 = vmatpush.bf16.msrb.mxu0 %v3256_v48  ;;  %2319 = vmatpush.bf16.msrb.mxu1 %v3512_v50  ;;  %v3616_v44 = vor.u32 %v3932_v46, %v3615_v45  ;;  %v3327_v48 = vld [vmem:[#allocation6 + $0x158] sm:$0xf]  ;;  %v3824_v45 = vld [vmem:[#allocation6 + $0x5c] sm:$0xf] }
 0x23f   :  { %2332 = vmatpush.bf16.msrb.mxu2 %v3260_v53  ;;  %2345 = vmatpush.bf16.msrb.mxu3 %v3516_v31  ;;  %v3860_v50 = vld [vmem:[#allocation6 + $0x174] sm:$0xf0]  ;;  %v3201_v46 = vld [vmem:[#allocation6 + $0x78] sm:$0xf0] }
 0x240   :  { %v3583_v53 = vld [vmem:[#allocation6 + $0x358] sm:$0xf]  ;;  %v3328_v56 = vor.u32 %v3860_v50, %v3327_v48  ;;  %v3204_v48 = vor.u32 %v3824_v45, %v3201_v46  ;;  %v3460_v50 = vor.u32 %v3888_v47, %v3457_v30 }
 0x241   :  { %v3924_v31 = vld [vmem:[#allocation6 + $0x374] sm:$0xf0] }
 0x242   :  { %2307 = vmatpush.bf16.msrb.mxu0 %v3224_v60  ;;  %2320 = vmatpush.bf16.msrb.mxu1 %v3480_v61  ;;  %v3584_v57 = vor.u32 %v3924_v31, %v3583_v53  ;;  %v3295_v60 = vld [vmem:[#allocation6 + $0x118] sm:$0xf]  ;;  %v3816_v53 = vld [vmem:[#allocation6 + $0x1c] sm:$0xf] }
 0x243   :  { %2333 = vmatpush.bf16.msrb.mxu2 %v3228_v0  ;;  %2346 = vmatpush.bf16.msrb.mxu3 %v3484_v1  ;;  %v3852_v61 = vld [vmem:[#allocation6 + $0x134] sm:$0xf0]  ;;  %v3169_v31 = vld [vmem:[#allocation6 + $0x38] sm:$0xf0] }
 0x244   :  { %v3551_v0 = vld [vmem:[#allocation6 + $0x318] sm:$0xf]  ;;  %v3296_v5 = vor.u32 %v3852_v61, %v3295_v60 }
 0x245   :  { %v3916_v1 = vld [vmem:[#allocation6 + $0x334] sm:$0xf0] }
 0x246   :  { %2308 = vmatpush.bf16.msrb.mxu0 %v3192_v8  ;;  %2321 = vmatpush.bf16.msrb.mxu1 %v3448_v9  ;;  %v3552_v6 = vor.u32 %v3916_v1, %v3551_v0  ;;  %v3844_v8 = vld [vmem:[#allocation6 + $0xf4] sm:$0xf0]  ;;  %v3300_v9 = vor.u32 %v3848_v2, %v3297_v19 }
 0x247   :  { %2334 = vmatpush.bf16.msrb.mxu2 %v3196_v13  ;;  %2347 = vmatpush.bf16.msrb.mxu3 %v3452_v14  ;;  %v3840_v13 = vld [vmem:[#allocation6 + $0xdc] sm:$0xf]  ;;  %v3264_v17 = vor.u32 %v3844_v8, %v3263_v7  ;;  %v3487_v24 = vld [vmem:[#allocation6 + $0x298] sm:$0xf] }
 0x248   :  { %v3265_v14 = vld [vmem:[#allocation6 + $0xf8] sm:$0xf0] }
 0x249   :  { %v3268_v22 = vor.u32 %v3840_v13, %v3265_v14  ;;  %v1540_v2 = vld [vmem:[%s4250_s8] sm:$0xff] }
 0x24a   :  { %2309 = vmatpush.bf16.msrb.mxu0 %v3160_v25  ;;  %2322 = vmatpush.bf16.msrb.mxu1 %v3416_v26  ;;  %v3900_v25 = vld [vmem:[#allocation6 + $0x2b4] sm:$0xf0]  ;;  %v3832_v26 = vld [vmem:[#allocation6 + $0x9c] sm:$0xf]  ;;  %v1543_v19 = vperm.slane %v1540_v2, 1  ;;  %v1548_v45 = vperm.slane %v1540_v2, 6 }
 0x24b   :  { %2335 = vmatpush.bf16.msrb.mxu2 %v3164_v32  ;;  %2348 = vmatpush.bf16.msrb.mxu3 %v3420_v33  ;;  %v3232_v32 = vor.u32 %v3836_v21, %v3231_v20  ;;  %v3488_v33 = vor.u32 %v3900_v25, %v3487_v24  ;;  %v3236_v38 = vor.u32 %v3832_v26, %v3233_v27 }
 0x24d   :  { %2310 = vmatmul.bf16.vlgmr.msrb.gmra.mxu0 %v4207_v58  ;;  %2323 = vmatmul.bf16.vlgmr.msrb.gmra.mxu1 %v4209_v59 }
 0x24e   :  { %2354 = vmatpush.bf16.msra.mxu0 %v3392_v34  ;;  %2367 = vmatpush.bf16.msra.mxu1 %v3648_v37  ;;  %v3199_v34 = vld [vmem:[#allocation6 + $0x58] sm:$0xf] }
 0x24f   :  { %2380 = vmatpush.bf16.msra.mxu2 %v3396_v41  ;;  %2393 = vmatpush.bf16.msra.mxu3 %v3652_v42  ;;  %v3828_v37 = vld [vmem:[#allocation6 + $0x74] sm:$0xf0] }
 0x250   :  { %2336 = vmatmul.bf16.vlgmr.msrb.gmra.mxu2 %v4207_v58  ;;  %2349 = vmatmul.bf16.vlgmr.msrb.gmra.mxu3 %v4209_v59  ;;  %v3455_v41 = vld [vmem:[#allocation6 + $0x258] sm:$0xf]  ;;  %v3200_v49 = vor.u32 %v3828_v37, %v3199_v34 }
 0x251   :  { %v3892_v42 = vld [vmem:[#allocation6 + $0x274] sm:$0xf0] }
 0x252   :  { %2355 = vmatpush.bf16.msra.mxu0 %v3360_v40  ;;  %2368 = vmatpush.bf16.msra.mxu1 %v3616_v44  ;;  %v3456_v43 = vor.u32 %v3892_v42, %v3455_v41  ;;  %v3167_v40 = vld [vmem:[#allocation6 + $0x18] sm:$0xf]  ;;  %v1547_v42 = vperm.slane %v1540_v2, 5 }
 0x253   :  { %2381 = vmatpush.bf16.msra.mxu2 %v3364_v51  ;;  %2394 = vmatpush.bf16.msra.mxu3 %v3620_v52  ;;  %v3820_v44 = vld [vmem:[#allocation6 + $0x34] sm:$0xf0] }
 0x254   :  { %v3423_v51 = vld [vmem:[#allocation6 + $0x218] sm:$0xf]  ;;  %v3168_v36 = vor.u32 %v3820_v44, %v3167_v40  ;;  %v1549_v40 = vperm.slane %v1540_v2, 7 }
 0x255   :  { %v3884_v52 = vld [vmem:[#allocation6 + $0x234] sm:$0xf0] }
 0x256   :  { %2356 = vmatpush.bf16.msra.mxu0 %v3328_v56  ;;  %2369 = vmatpush.bf16.msra.mxu1 %v3584_v57  ;;  %v3424_v55 = vor.u32 %v3884_v52, %v3423_v51  ;;  %v3172_v56 = vor.u32 %v3816_v53, %v3169_v31  ;;  %v3428_v57 = vor.u32 %v3880_v35, %v3425_v54 }
 0x257   :  { %2382 = vmatpush.bf16.msra.mxu2 %v3332_v62  ;;  %2395 = vmatpush.bf16.msra.mxu3 %v3588_v63 }
 0x25a   :  { %2357 = vmatpush.bf16.msra.mxu0 %v3296_v5  ;;  %2370 = vmatpush.bf16.msra.mxu1 %v3552_v6  ;;  %v1544_v5 = vperm.slane %v1540_v2, 2 }
 0x25b   :  { %2383 = vmatpush.bf16.msra.mxu2 %v3300_v9  ;;  %2396 = vmatpush.bf16.msra.mxu3 %v3556_v10 }
 0x25e   :  { %2358 = vmatpush.bf16.msra.mxu0 %v3264_v17  ;;  %2371 = vmatpush.bf16.msra.mxu1 %v3520_v18 }
 0x25f   :  { %2384 = vmatpush.bf16.msra.mxu2 %v3268_v22  ;;  %2397 = vmatpush.bf16.msra.mxu3 %v3524_v23 }
 0x262   :  { %2359 = vmatpush.bf16.msra.mxu0 %v3232_v32  ;;  %2372 = vmatpush.bf16.msra.mxu1 %v3488_v33 }
 0x263   :  { %2385 = vmatpush.bf16.msra.mxu2 %v3236_v38  ;;  %2398 = vmatpush.bf16.msra.mxu3 %v3492_v39 }
 0x266   :  { %2360 = vmatpush.bf16.msra.mxu0 %v3200_v49  ;;  %2373 = vmatpush.bf16.msra.mxu1 %v3456_v43  ;;  %v1546_v49 = vperm.slane %v1540_v2, 4 }
 0x267   :  { %2386 = vmatpush.bf16.msra.mxu2 %v3204_v48  ;;  %2399 = vmatpush.bf16.msra.mxu3 %v3460_v50 }
 0x26a   :  { %2361 = vmatpush.bf16.msra.mxu0 %v3168_v36  ;;  %2374 = vmatpush.bf16.msra.mxu1 %v3424_v55 }
 0x26b   :  { %2387 = vmatpush.bf16.msra.mxu2 %v3172_v56  ;;  %2400 = vmatpush.bf16.msra.mxu3 %v3428_v57 }
 0x26d   :  { %2362 = vmatmul.bf16.vlgmr.msra.gmra.mxu0 %v4207_v58  ;;  %2375 = vmatmul.bf16.vlgmr.msra.gmra.mxu1 %v4209_v59 }
 0x26e   :  { %2388 = vmatmul.bf16.vlgmr.msra.gmra.mxu2 %v4207_v58  ;;  %2401 = vmatmul.bf16.vlgmr.msra.gmra.mxu3 %v4209_v59  ;;  %v1542_v58 = vperm.slane %v1540_v2, 0  ;;  %v1545_v59 = vperm.slane %v1540_v2, 3 }
 0x2a9   :  { %v2207_v60 = vpop.f32.mrf.mxu0  ;;  %v2220_v61 = vpop.f32.mrf.mxu1 }
 0x2aa   :  { %v2208_v13 = vadd.f32 %v2207_v60, %v1542_v58 }
 0x2ac   :  { %v2221_v21 = vadd.f32 %v2220_v61, %v2208_v13 }
 0x2b0   :  { %v2233_v62 = vpop.f32.mrf.mxu2  ;;  %v2246_v63 = vpop.f32.mrf.mxu3 }
 0x2b1   :  { %v2209_v0 = vpop.f32.mrf.mxu0  ;;  %v2222_v1 = vpop.f32.mrf.mxu1  ;;  %v2234_v8 = vadd.f32 %v2233_v62, %v1543_v19 }
 0x2b3   :  { %v2247_v10 = vadd.f32 %v2246_v63, %v2234_v8 }
 0x2b5   :  { %v2414_v18 = vrot.slane %v2247_v10, 6 }
 0x2b7   :  { %v2421_v24 = vsel %vm2420_vm0, %v2221_v21, %v2414_v18 }
 0x2b8   :  { %v2235_v3 = vpop.f32.mrf.mxu2  ;;  %v2248_v4 = vpop.f32.mrf.mxu3 }
 0x2b9   :  { %v2259_v6 = vpop.f32.mrf.mxu0  ;;  %v2272_v7 = vpop.f32.mrf.mxu1 }
 0x2ba   :  { %v2260_v9 = vadd.f32 %v2259_v6, %v1544_v5 }
 0x2bc   :  { %v2273_v14 = vadd.f32 %v2272_v7, %v2260_v9 }
 0x2be   :  { %v2415_v22 = vrot.slane %v2273_v14, 4 }
 0x2c0   :  { %v2285_v11 = vpop.f32.mrf.mxu2  ;;  %v2298_v12 = vpop.f32.mrf.mxu3 }
 0x2c1   :  { %v2286_v15 = vadd.f32 %v2285_v11, %v1545_v59  ;;  %v2261_v16 = vpop.f32.mrf.mxu0  ;;  %v2274_v17 = vpop.f32.mrf.mxu1 }
 0x2c3   :  { %v2299_v20 = vadd.f32 %v2298_v12, %v2286_v15 }
 0x2c5   :  { %v2416_v23 = vrot.slane %v2299_v20, 2 }
 0x2c7   :  { %v2423_v25 = vsel %vm2422_vm1, %v2415_v22, %v2416_v23 }
 0x2c8   :  { %v2425_v26 = vsel %vm2424_vm2, %v2421_v24, %v2423_v25  ;;  %v2287_v27 = vpop.f32.mrf.mxu2  ;;  %v2300_v28 = vpop.f32.mrf.mxu3 }
 0x2c9   :  { %2487 = vst [vmem:[%s4251_s9] sm:$0xff] %v2425_v26 }
 0x2ca   :  { %v2311_v29 = vpop.f32.mrf.mxu0  ;;  %v2324_v32 = vpop.f32.mrf.mxu1 }
 0x2cb   :  { %v2312_v51 = vadd.f32 %v2311_v29, %v1546_v49 }
 0x2cd   :  { %v2325_v55 = vadd.f32 %v2324_v32, %v2312_v51 }
 0x2d2   :  { %v2313_v37 = vpop.f32.mrf.mxu0  ;;  %v2326_v38 = vpop.f32.mrf.mxu1 }
 0x2d3   :  { %v2337_v33 = vpop.f32.mrf.mxu2  ;;  %v2350_v34 = vpop.f32.mrf.mxu3 }
 0x2d4   :  { %v2338_v30 = vadd.f32 %v2337_v33, %v1547_v42 }
 0x2d6   :  { %v2351_v44 = vadd.f32 %v2350_v34, %v2338_v30 }
 0x2d8   :  { %v2417_v54 = vrot.slane %v2351_v44, 6 }
 0x2da   :  { %v2426_v60 = vsel %vm2420_vm0, %v2325_v55, %v2417_v54 }
 0x2db   :  { %v2339_v39 = vpop.f32.mrf.mxu2  ;;  %v2352_v41 = vpop.f32.mrf.mxu3 }
 0x2ea   :  { %v2363_v46 = vpop.f32.mrf.mxu0  ;;  %v2376_v47 = vpop.f32.mrf.mxu1 }
 0x2eb   :  { %v2364_v43 = vadd.f32 %v2363_v46, %v1548_v45 }
 0x2ed   :  { %v2377_v52 = vadd.f32 %v2376_v47, %v2364_v43 }
 0x2ef   :  { %v2418_v56 = vrot.slane %v2377_v52, 4 }
 0x2f1   :  { %v2389_v48 = vpop.f32.mrf.mxu2  ;;  %v2402_v50 = vpop.f32.mrf.mxu3 }
 0x2f2   :  { %v2390_v53 = vadd.f32 %v2389_v48, %v1549_v40  ;;  %v2365_v31 = vpop.f32.mrf.mxu0  ;;  %v2378_v35 = vpop.f32.mrf.mxu1 }
 0x2f4   :  { %v2403_v36 = vadd.f32 %v2402_v50, %v2390_v53 }
 0x2f6   :  { %v2419_v57 = vrot.slane %v2403_v36, 2 }
 0x2f8   :  { %v2427_v61 = vsel %vm2422_vm1, %v2418_v56, %v2419_v57 }
 0x2f9   :  { %v2428_v62 = vsel %vm2424_vm2, %v2426_v60, %v2427_v61  ;;  %v2391_v63 = vpop.f32.mrf.mxu2  ;;  %v2404_v0 = vpop.f32.mrf.mxu3 }
 0x2fa   :  { %2489 = vst [vmem:[%s4251_s9 + $0x8] sm:$0xff] %v2428_v62 }
 0x2fb   :  { %2495 = vsyncpa [#allocation3], 1 }
 0x2fc   :  { %2496 = vsyncpa [#allocation5], 1 }

</bundles_post_ra>
